<compile_context>
chip_gen: v7x
topology: tpu7x:2x2x1
jax: 0.10.0
libtpu: 0.0.40
codegen_flags: <defaults>
</compile_context>

<pallas_src>
import numpy as np
import jax
import jax.numpy as jnp
from jax.experimental import pallas as pl
from jax.experimental.pallas import tpu as pltpu


def _make_kernel(r2, thr2, emit_adj):
    """Builds the tiled (target i, source j) kernel body.

    r2       : python float, squared position-graph radius (baked constant)
    thr2     : tuple of python floats, squared CDF thresholds (baked constants)
    emit_adj : bool, whether the dense int8 adjacency output exists
    """

    def kernel(xi_ref, xsqi_ref, xjT_ref, xsqj_ref, pi_ref, pjT_ref,
               bci_ref, brj_ref, ones_ref, w_ref, b_ref, *rest):
        if emit_adj:
            conf_ref, msg_ref, adj_ref, acc_msg2, acc_cnt = rest
        else:
            conf_ref, msg_ref, acc_msg2, acc_cnt = rest
            adj_ref = None

        j = pl.program_id(1)

        @pl.when(j == 0)
        def _():
            acc_msg2[...] = jnp.zeros_like(acc_msg2)
            acc_cnt[...] = jnp.zeros_like(acc_cnt)

        xi = xi_ref[...]        # (TI, D)
        xjT = xjT_ref[...]      # (D, TJ)
        pi = pi_ref[...]        # (TI, P)
        pjT = pjT_ref[...]      # (P, TJ)

        # --- radius-graph adjacency: squared position distance on the VPU ---
        # (a length-3 contraction would pad the MXU K-dim; 3 FMAs are cheaper)
        d0 = pi[:, 0:1] - pjT[0:1, :]
        pd2 = d0 * d0
        for c in range(1, pi.shape[1]):
            dc = pi[:, c:c + 1] - pjT[c:c + 1, :]
            pd2 = pd2 + dc * dc
        same_batch = bci_ref[...] == brj_ref[...]            # (TI, TJ)
        adj = jnp.logical_and(same_batch, pd2 <= r2)         # (TI, TJ) bool

        # --- squared feature distance: ||x_i||^2 + ||x_j||^2 - 2 x_i.x_j ---
        # both squared norms are precomputed in the wrapper (no in-kernel XLU
        # lane reduce); the length-D contraction goes to the MXU.
        fd2 = xsqi_ref[...] + xsqj_ref[...] - 2.0 * jnp.dot(
            xi, xjT, preferred_element_type=jnp.float32)     # (TI, TJ)
        masked_fd2 = jnp.where(adj, fd2, jnp.inf)            # mask once

        ones_jk = ones_ref[...]                              # (TJ, K) bf16 all-ones
        num_k = acc_msg2.shape[1]
        lane_ids = jax.lax.broadcasted_iota(jnp.int32, (1, num_k), 1)

        # --- neighbor count: lane reduction offloaded to the MXU ---
        adj_bf16 = adj.astype(jnp.bfloat16)                  # exact 0/1 values
        cnt_rep = jnp.dot(adj_bf16, ones_jk,
                          preferred_element_type=jnp.float32)  # (TI, K) replicated
        acc_cnt[...] += cnt_rep[:, :1]

        # --- CDF message: per-threshold neighbor counts on the MXU ---
        # No sqrt (compare fd2 against thr^2), no (TI,K,TJ) tensor, no XLU lane
        # reduces, no per-step concatenate: each bf16 0/1 mask is reduced by a
        # dot with the all-ones column block (count replicated across K lanes),
        # then masked into lane k with a one-hot row and summed.
        upd = None
        for k, t2 in enumerate(thr2):
            mask = (masked_fd2 <= t2).astype(jnp.bfloat16)   # (TI, TJ) 0/1
            rep = jnp.dot(mask, ones_jk,
                          preferred_element_type=jnp.float32)  # (TI, K)
            part = rep * (lane_ids == k).astype(jnp.float32)   # keep lane k only
            upd = part if upd is None else upd + part
        acc_msg2[...] += upd

        if adj_ref is not None:
            adj_ref[...] = adj.astype(jnp.int8)              # 1-byte O(N^2) writeback

        @pl.when(j == pl.num_programs(1) - 1)
        def _():
            # self-loop guarantees cnt >= 1 for real points; padded rows clamp to 1.
            # exact division (once per i-block) -> tight tolerances vs. reference.
            cnt = jnp.maximum(acc_cnt[...], 1.0)
            msg2 = acc_msg2[...]
            msg = jnp.concatenate([msg2 / cnt, msg2], axis=-1)        # (TI, 2K)
            msg_ref[...] = msg
            conf_ref[...] = jnp.dot(
                msg, w_ref[...], preferred_element_type=jnp.float32) + b_ref[...]

    return kernel


def _round_up(n, m):
    return ((n + m - 1) // m) * m


def _pick_tiles(n):
    # tile_i: largest of {32, 64, 128, 256} that keeps >= 2 i-blocks (the
    # parallel axis is what shards across v7x's two TensorCores) with <= ~30%
    # padding waste on the i axis.  Minimum 32 keeps the int8 adjacency output
    # on its native (32, 128) tiling.
    tile_i = 32
    for t in (64, 128, 256):
        n_pad = _round_up(n, t)
        if n_pad // t >= 2 and 10 * (n_pad - n) <= 3 * n:
            tile_i = t
    # tile_j: lane-dense multiple of 128, large enough to amortize the ~0.35us
    # per-grid-step overhead; capped at 1024 (working set stays small in VMEM).
    tile_j = min(1024, _round_up(max(n, 128), 128))
    if n > 1024 and _round_up(n, 1024) - n > 512:
        tile_j = 512          # avoid >50% of a 1024-tile worth of j padding
    n_i = _round_up(n, tile_i)
    n_j = _round_up(n, tile_j)
    return tile_i, tile_j, n_i, n_j


def conf_pred_forward(x, pos, batch, lin_w, lin_b, *, r_min, r_max, oup_dim,
                      return_adjacency=True):
    N, D = x.shape
    P = pos.shape[1]
    K = oup_dim
    tile_i, tile_j, n_i, n_j = _pick_tiles(N)

    # thresholds are compile-time constants -> bake their squares into the kernel
    thr2 = tuple(float(t) ** 2 for t in np.linspace(r_min, r_max, K))
    r2 = float(r_max) ** 2

    xf = x.astype(jnp.float32)
    pf = pos.astype(jnp.float32)
    bf = batch.astype(jnp.float32)

    # i-side (target) operands, padded to n_i rows; ||x_i||^2 precomputed here.
    xi = jnp.zeros((n_i, D), jnp.float32).at[:N].set(xf)
    xsqi = jnp.sum(xi * xi, axis=-1, keepdims=True)              # (n_i, 1)
    pi = jnp.zeros((n_i, P), jnp.float32).at[:N].set(pf)
    bi = jnp.full((n_i, 1), -1.0, jnp.float32).at[:N, 0].set(bf)  # pad sentinel -1

    # j-side (source) operands, padded to n_j and pre-transposed in plain JAX.
    xj = jnp.zeros((n_j, D), jnp.float32).at[:N].set(xf)
    xjT = xj.T                                                   # (D, n_j)
    xsqj = jnp.sum(xj * xj, axis=-1)[None, :]                    # (1, n_j)
    pj = jnp.zeros((n_j, P), jnp.float32).at[:N].set(pf)
    pjT = pj.T                                                   # (P, n_j)
    bj = jnp.full((1, n_j), -2.0, jnp.float32).at[0, :N].set(bf)  # pad sentinel -2

    # all-ones bf16 reducer: turns every cross-lane count into an MXU dot.
    ones_jk = jnp.ones((tile_j, K), jnp.bfloat16)

    w_t = lin_w.T.astype(jnp.float32)                            # (2K, 2)
    b_vec = lin_b.reshape(1, 2).astype(jnp.float32)

    kernel = _make_kernel(r2, thr2, return_adjacency)
    grid = (n_i // tile_i, n_j // tile_j)

    in_specs = [
        pl.BlockSpec((tile_i, D), lambda i, j: (i, 0)),      # x_i
        pl.BlockSpec((tile_i, 1), lambda i, j: (i, 0)),      # ||x_i||^2
        pl.BlockSpec((D, tile_j), lambda i, j: (0, j)),      # x_j^T
        pl.BlockSpec((1, tile_j), lambda i, j: (0, j)),      # ||x_j||^2
        pl.BlockSpec((tile_i, P), lambda i, j: (i, 0)),      # pos_i
        pl.BlockSpec((P, tile_j), lambda i, j: (0, j)),      # pos_j^T
        pl.BlockSpec((tile_i, 1), lambda i, j: (i, 0)),      # batch_i
        pl.BlockSpec((1, tile_j), lambda i, j: (0, j)),      # batch_j
        pl.BlockSpec((tile_j, K), lambda i, j: (0, 0)),      # bf16 ones reducer
        pl.BlockSpec((2 * K, 2), lambda i, j: (0, 0)),       # lin1.weight^T
        pl.BlockSpec((1, 2), lambda i, j: (0, 0)),           # lin1.bias
    ]
    out_shape = [
        jax.ShapeDtypeStruct((n_i, 2), jnp.float32),
        jax.ShapeDtypeStruct((n_i, 2 * K), jnp.float32),
    ]
    out_specs = [
        pl.BlockSpec((tile_i, 2), lambda i, j: (i, 0)),       # conf
        pl.BlockSpec((tile_i, 2 * K), lambda i, j: (i, 0)),   # msg
    ]
    if return_adjacency:
        out_shape.append(jax.ShapeDtypeStruct((n_i, n_j), jnp.int8))
        out_specs.append(pl.BlockSpec((tile_i, tile_j), lambda i, j: (i, j)))

    outs = pl.pallas_call(
        kernel,
        out_shape=tuple(out_shape),
        grid_spec=pltpu.PrefetchScalarGridSpec(
            num_scalar_prefetch=0,
            grid=grid,
            in_specs=in_specs,
            out_specs=out_specs,
            scratch_shapes=[
                pltpu.VMEM((tile_i, K), jnp.float32),   # msg2 accumulator
                pltpu.VMEM((tile_i, 1), jnp.float32),   # neighbor count
            ],
        ),
        compiler_params=pltpu.CompilerParams(
            dimension_semantics=("parallel", "arbitrary"),
            vmem_limit_bytes=32 * 1024 * 1024),
    )(xi, xsqi, xjT, xsqj, pi, pjT, bi, bj, ones_jk, w_t, b_vec)

    if return_adjacency:
        conf, msg, adj = outs
        return conf[:N], msg[:N], adj[:N, :N]
    conf, msg = outs
    return conf[:N], msg[:N], None


def reference_forward(x, pos, batch, lin_w, lin_b, *, r_min, r_max, oup_dim):
    thr = jnp.asarray(np.linspace(r_min, r_max, oup_dim), jnp.float32)
    x = x.astype(jnp.float32)
    pos = pos.astype(jnp.float32)
    ps = jnp.sum(pos * pos, -1)
    pd2 = ps[:, None] + ps[None, :] - 2.0 * pos @ pos.T
    adj = (jnp.logical_and(batch[:, None] == batch[None, :],
                           pd2 <= float(r_max) ** 2)).astype(jnp.float32)
    xs = jnp.sum(x * x, -1)
    fd2 = xs[:, None] + xs[None, :] - 2.0 * x @ x.T
    fd = jnp.sqrt(jnp.maximum(fd2, 0.0))
    ind = (fd[:, :, None] <= thr[None, None, :]).astype(jnp.float32)
    msg2 = jnp.sum(adj[:, :, None] * ind, axis=1)
    cnt = jnp.maximum(jnp.sum(adj, axis=1, keepdims=True), 1.0)
    msg = jnp.concatenate([msg2 / cnt, msg2], axis=-1)
    conf = msg @ lin_w.T + lin_b
    return conf, msg, adj


if __name__ == "__main__":
    key = jax.random.PRNGKey(0)
    N, D, P, K = 32, 32, 3, 16          # points, feature dim, pos dim, oup_dim
    r_min, r_max = 0.05, 0.6

    k1, k2, k3, k4 = jax.random.split(key, 4)
    x = 0.1 * jax.random.normal(k1, (N, D), jnp.float32)
    pos = jax.random.uniform(k2, (N, P), jnp.float32)
    batch = jnp.concatenate([jnp.zeros(N // 2), jnp.ones(N // 2)]).astype(jnp.float32)

    # deterministic Linear(2K, 2) init (torch-style uniform bound)
    bound = 1.0 / np.sqrt(2 * K)
    lin_w = jax.random.uniform(k3, (2, 2 * K), jnp.float32, -bound, bound)
    lin_b = jax.random.uniform(k4, (2,), jnp.float32, -bound, bound)

    conf, msg, adj = conf_pred_forward(
        x, pos, batch, lin_w, lin_b, r_min=r_min, r_max=r_max, oup_dim=K,
        return_adjacency=True)
    jax.block_until_ready((conf, msg, adj))

    # edge_index (variable length) extracted outside the kernel from the dense mask
    rows, cols = np.nonzero(np.asarray(adj))
    edge_index = np.stack([rows, cols])

    conf_r, msg_r, adj_r = reference_forward(
        x, pos, batch, lin_w, lin_b, r_min=r_min, r_max=r_max, oup_dim=K)
    np.testing.assert_array_equal(np.asarray(adj),
                                  np.asarray(adj_r).astype(np.int8))
    # counts are exact (bf16 0/1 masks, f32 accumulation) and the mean uses
    # exact division -> tight tolerances
    np.testing.assert_allclose(np.asarray(msg), np.asarray(msg_r), atol=1e-4, rtol=1e-4)
    np.testing.assert_allclose(np.asarray(conf), np.asarray(conf_r), atol=1e-4, rtol=1e-4)
    print("KERNEL_OK")
</pallas_src>

<mosaic_0001>
module attributes {stable_mosaic.version = 11 : i64} {
  func.func @kernel(%arg0: i32, %arg1: i32, %arg2: memref<32x32xf32, #tpu.memory_space<vmem>>, %arg3: memref<32x1xf32, #tpu.memory_space<vmem>>, %arg4: memref<32x128xf32, #tpu.memory_space<vmem>>, %arg5: memref<1x128xf32, #tpu.memory_space<vmem>>, %arg6: memref<32x3xf32, #tpu.memory_space<vmem>>, %arg7: memref<3x128xf32, #tpu.memory_space<vmem>>, %arg8: memref<32x1xf32, #tpu.memory_space<vmem>>, %arg9: memref<1x128xf32, #tpu.memory_space<vmem>>, %arg10: memref<128x16xbf16, #tpu.memory_space<vmem>>, %arg11: memref<32x2xf32, #tpu.memory_space<vmem>>, %arg12: memref<1x2xf32, #tpu.memory_space<vmem>>, %arg13: memref<32x2xf32, #tpu.memory_space<vmem>>, %arg14: memref<32x32xf32, #tpu.memory_space<vmem>>, %arg15: memref<32x128xi8, #tpu.memory_space<vmem>>, %arg16: memref<32x16xf32, #tpu.memory_space<vmem>>, %arg17: memref<32x1xf32, #tpu.memory_space<vmem>>) attributes {dimension_semantics = [#tpu.dimension_semantics<parallel>, #tpu.dimension_semantics<arbitrary>], iteration_bounds = array<i64: 1, 1>, scalar_prefetch = 0 : i64, scratch_operands = 2 : i64, tpu.core_type = #tpu.core_type<tc>, window_params = [{transform_indices = @transform_0, window_bounds = array<i64: 32, 32>}, {transform_indices = @transform_1, window_bounds = array<i64: 32, 1>}, {transform_indices = @transform_2, window_bounds = array<i64: 32, 128>}, {transform_indices = @transform_3, window_bounds = array<i64: 1, 128>}, {transform_indices = @transform_4, window_bounds = array<i64: 32, 3>}, {transform_indices = @transform_5, window_bounds = array<i64: 3, 128>}, {transform_indices = @transform_6, window_bounds = array<i64: 32, 1>}, {transform_indices = @transform_7, window_bounds = array<i64: 1, 128>}, {pipeline_mode = #tpu.pipeline_mode<synchronous>, transform_indices = @transform_8, window_bounds = array<i64: 128, 16>}, {pipeline_mode = #tpu.pipeline_mode<synchronous>, transform_indices = @transform_9, window_bounds = array<i64: 32, 2>}, {pipeline_mode = #tpu.pipeline_mode<synchronous>, transform_indices = @transform_10, window_bounds = array<i64: 1, 2>}, {transform_indices = @transform_11, window_bounds = array<i64: 32, 2>}, {transform_indices = @transform_12, window_bounds = array<i64: 32, 32>}, {transform_indices = @transform_13, window_bounds = array<i64: 32, 128>}]} {
    %c0_i32 = arith.constant 0 : i32
    %0 = arith.cmpi eq, %arg1, %c0_i32 : i32
    %1 = arith.extui %0 : i1 to i32
    %c0_i32_0 = arith.constant 0 : i32
    %2 = arith.cmpi ne, %1, %c0_i32_0 : i32
    scf.if %2 {
      %cst_67 = arith.constant 0.000000e+00 : f32
      %271 = vector.broadcast %cst_67 : f32 to vector<32x16xf32>
      %c0_68 = arith.constant 0 : index
      %c0_69 = arith.constant 0 : index
      %272 = vector.load %arg16[%c0_68, %c0_69] : memref<32x16xf32, #tpu.memory_space<vmem>>, vector<32x16xf32>
      tpu.vector_store %arg16[%c0_68, %c0_69], %271 {strides = array<i32>} : memref<32x16xf32, #tpu.memory_space<vmem>>, vector<32x16xf32>,
      %cst_70 = arith.constant 0.000000e+00 : f32
      %273 = vector.broadcast %cst_70 : f32 to vector<32x1xf32>
      %c0_71 = arith.constant 0 : index
      %c0_72 = arith.constant 0 : index
      %274 = vector.load %arg17[%c0_71, %c0_72] : memref<32x1xf32, #tpu.memory_space<vmem>>, vector<32x1xf32>
      tpu.vector_store %arg17[%c0_71, %c0_72], %273 {strides = array<i32>} : memref<32x1xf32, #tpu.memory_space<vmem>>, vector<32x1xf32>,
    } else {
    }
    %c0 = arith.constant 0 : index
    %c0_1 = arith.constant 0 : index
    %3 = vector.load %arg2[%c0, %c0_1] : memref<32x32xf32, #tpu.memory_space<vmem>>, vector<32x32xf32>
    %c0_2 = arith.constant 0 : index
    %c0_3 = arith.constant 0 : index
    %4 = vector.load %arg4[%c0_2, %c0_3] : memref<32x128xf32, #tpu.memory_space<vmem>>, vector<32x128xf32>
    %c0_4 = arith.constant 0 : index
    %c0_5 = arith.constant 0 : index
    %5 = vector.load %arg6[%c0_4, %c0_5] : memref<32x3xf32, #tpu.memory_space<vmem>>, vector<32x3xf32>
    %c0_6 = arith.constant 0 : index
    %c0_7 = arith.constant 0 : index
    %6 = vector.load %arg7[%c0_6, %c0_7] : memref<3x128xf32, #tpu.memory_space<vmem>>, vector<3x128xf32>
    %7 = vector.extract_strided_slice %5 {offsets = [0, 0], sizes = [32, 1], strides = [1, 1]} : vector<32x3xf32> to vector<32x1xf32>
    %8 = vector.extract_strided_slice %6 {offsets = [0, 0], sizes = [1, 128], strides = [1, 1]} : vector<3x128xf32> to vector<1x128xf32>
    %9 = vector.broadcast %7 : vector<32x1xf32> to vector<32x128xf32>
    %10 = vector.broadcast %8 : vector<1x128xf32> to vector<32x128xf32>
    %11 = arith.subf %9, %10 : vector<32x128xf32>
    %12 = arith.mulf %11, %11 : vector<32x128xf32>
    %13 = vector.extract_strided_slice %5 {offsets = [0, 1], sizes = [32, 1], strides = [1, 1]} : vector<32x3xf32> to vector<32x1xf32>
    %14 = vector.extract_strided_slice %6 {offsets = [1, 0], sizes = [1, 128], strides = [1, 1]} : vector<3x128xf32> to vector<1x128xf32>
    %15 = vector.broadcast %13 : vector<32x1xf32> to vector<32x128xf32>
    %16 = vector.broadcast %14 : vector<1x128xf32> to vector<32x128xf32>
    %17 = arith.subf %15, %16 : vector<32x128xf32>
    %18 = arith.mulf %17, %17 : vector<32x128xf32>
    %19 = arith.addf %12, %18 : vector<32x128xf32>
    %20 = vector.extract_strided_slice %5 {offsets = [0, 2], sizes = [32, 1], strides = [1, 1]} : vector<32x3xf32> to vector<32x1xf32>
    %21 = vector.extract_strided_slice %6 {offsets = [2, 0], sizes = [1, 128], strides = [1, 1]} : vector<3x128xf32> to vector<1x128xf32>
    %22 = vector.broadcast %20 : vector<32x1xf32> to vector<32x128xf32>
    %23 = vector.broadcast %21 : vector<1x128xf32> to vector<32x128xf32>
    %24 = arith.subf %22, %23 : vector<32x128xf32>
    %25 = arith.mulf %24, %24 : vector<32x128xf32>
    %26 = arith.addf %19, %25 : vector<32x128xf32>
    %c0_8 = arith.constant 0 : index
    %c0_9 = arith.constant 0 : index
    %27 = vector.load %arg8[%c0_8, %c0_9] : memref<32x1xf32, #tpu.memory_space<vmem>>, vector<32x1xf32>
    %c0_10 = arith.constant 0 : index
    %c0_11 = arith.constant 0 : index
    %28 = vector.load %arg9[%c0_10, %c0_11] : memref<1x128xf32, #tpu.memory_space<vmem>>, vector<1x128xf32>
    %29 = vector.broadcast %27 : vector<32x1xf32> to vector<32x128xf32>
    %30 = vector.broadcast %28 : vector<1x128xf32> to vector<32x128xf32>
    %31 = arith.cmpf oeq, %29, %30 : vector<32x128xf32>
    %cst = arith.constant 3.600000e-01 : f32
    %32 = vector.broadcast %cst : f32 to vector<32x128xf32>
    %33 = arith.cmpf ole, %26, %32 : vector<32x128xf32>
    %34 = arith.andi %31, %33 : vector<32x128xi1>
    %c0_12 = arith.constant 0 : index
    %c0_13 = arith.constant 0 : index
    %35 = vector.load %arg3[%c0_12, %c0_13] : memref<32x1xf32, #tpu.memory_space<vmem>>, vector<32x1xf32>
    %c0_14 = arith.constant 0 : index
    %c0_15 = arith.constant 0 : index
    %36 = vector.load %arg5[%c0_14, %c0_15] : memref<1x128xf32, #tpu.memory_space<vmem>>, vector<1x128xf32>
    %37 = vector.broadcast %35 : vector<32x1xf32> to vector<32x128xf32>
    %38 = vector.broadcast %36 : vector<1x128xf32> to vector<32x128xf32>
    %39 = arith.addf %37, %38 : vector<32x128xf32>
    %cst_16 = arith.constant dense<0.000000e+00> : vector<32x128xf32>
    %40 = tpu.matmul %3, %4, %cst_16 {dimension_numbers = #tpu.dot_dimension_numbers<[1], [0], [0], [1], [0, 0, 1, 1], [], []>} : vector<32x32xf32>, vector<32x128xf32>, vector<32x128xf32> -> vector<32x128xf32>
    %cst_17 = arith.constant 2.000000e+00 : f32
    %41 = vector.broadcast %cst_17 : f32 to vector<32x128xf32>
    %42 = arith.mulf %41, %40 : vector<32x128xf32>
    %43 = arith.subf %39, %42 : vector<32x128xf32>
    %cst_18 = arith.constant 0x7F800000 : f32
    %44 = vector.broadcast %cst_18 : f32 to vector<32x128xf32>
    %45 = arith.select %34, %43, %44 : vector<32x128xi1>, vector<32x128xf32>
    %c0_19 = arith.constant 0 : index
    %c0_20 = arith.constant 0 : index
    %46 = vector.load %arg10[%c0_19, %c0_20] : memref<128x16xbf16, #tpu.memory_space<vmem>>, vector<128x16xbf16>
    %47 = tpu.iota {dimensions = array<i32: 1>} : vector<1x16xi32>
    %48 = arith.extui %34 : vector<32x128xi1> to vector<32x128xi32>
    %49 = arith.sitofp %48 : vector<32x128xi32> to vector<32x128xf32>
    %50 = arith.truncf %49 : vector<32x128xf32> to vector<32x128xbf16>
    %cst_21 = arith.constant dense<0.000000e+00> : vector<32x16xf32>
    %51 = tpu.matmul %50, %46, %cst_21 {dimension_numbers = #tpu.dot_dimension_numbers<[1], [0], [0], [1], [0, 0, 1, 1], [], []>} : vector<32x128xbf16>, vector<128x16xbf16>, vector<32x16xf32> -> vector<32x16xf32>
    %c0_22 = arith.constant 0 : index
    %c0_23 = arith.constant 0 : index
    %52 = vector.load %arg17[%c0_22, %c0_23] : memref<32x1xf32, #tpu.memory_space<vmem>>, vector<32x1xf32>
    %53 = vector.extract_strided_slice %51 {offsets = [0, 0], sizes = [32, 1], strides = [1, 1]} : vector<32x16xf32> to vector<32x1xf32>
    %54 = arith.addf %52, %53 : vector<32x1xf32>
    %c0_24 = arith.constant 0 : index
    %c0_25 = arith.constant 0 : index
    %55 = vector.load %arg17[%c0_24, %c0_25] : memref<32x1xf32, #tpu.memory_space<vmem>>, vector<32x1xf32>
    tpu.vector_store %arg17[%c0_24, %c0_25], %54 {strides = array<i32>} : memref<32x1xf32, #tpu.memory_space<vmem>>, vector<32x1xf32>,
    %cst_26 = arith.constant 2.500000e-03 : f32
    %56 = vector.broadcast %cst_26 : f32 to vector<32x128xf32>
    %57 = arith.cmpf ole, %45, %56 : vector<32x128xf32>
    %58 = arith.extui %57 : vector<32x128xi1> to vector<32x128xi32>
    %59 = arith.sitofp %58 : vector<32x128xi32> to vector<32x128xf32>
    %60 = arith.truncf %59 : vector<32x128xf32> to vector<32x128xbf16>
    %cst_27 = arith.constant dense<0.000000e+00> : vector<32x16xf32>
    %61 = tpu.matmul %60, %46, %cst_27 {dimension_numbers = #tpu.dot_dimension_numbers<[1], [0], [0], [1], [0, 0, 1, 1], [], []>} : vector<32x128xbf16>, vector<128x16xbf16>, vector<32x16xf32> -> vector<32x16xf32>
    %c0_i32_28 = arith.constant 0 : i32
    %62 = vector.broadcast %c0_i32_28 : i32 to vector<1x16xi32>
    %63 = arith.cmpi eq, %47, %62 : vector<1x16xi32>
    %64 = arith.extui %63 : vector<1x16xi1> to vector<1x16xi32>
    %65 = arith.sitofp %64 : vector<1x16xi32> to vector<1x16xf32>
    %66 = vector.broadcast %65 : vector<1x16xf32> to vector<32x16xf32>
    %67 = arith.mulf %61, %66 : vector<32x16xf32>
    %cst_29 = arith.constant 0.00751111097 : f32
    %68 = vector.broadcast %cst_29 : f32 to vector<32x128xf32>
    %69 = arith.cmpf ole, %45, %68 : vector<32x128xf32>
    %70 = arith.extui %69 : vector<32x128xi1> to vector<32x128xi32>
    %71 = arith.sitofp %70 : vector<32x128xi32> to vector<32x128xf32>
    %72 = arith.truncf %71 : vector<32x128xf32> to vector<32x128xbf16>
    %cst_30 = arith.constant dense<0.000000e+00> : vector<32x16xf32>
    %73 = tpu.matmul %72, %46, %cst_30 {dimension_numbers = #tpu.dot_dimension_numbers<[1], [0], [0], [1], [0, 0, 1, 1], [], []>} : vector<32x128xbf16>, vector<128x16xbf16>, vector<32x16xf32> -> vector<32x16xf32>
    %c1_i32 = arith.constant 1 : i32
    %74 = vector.broadcast %c1_i32 : i32 to vector<1x16xi32>
    %75 = arith.cmpi eq, %47, %74 : vector<1x16xi32>
    %76 = arith.extui %75 : vector<1x16xi1> to vector<1x16xi32>
    %77 = arith.sitofp %76 : vector<1x16xi32> to vector<1x16xf32>
    %78 = vector.broadcast %77 : vector<1x16xf32> to vector<32x16xf32>
    %79 = arith.mulf %73, %78 : vector<32x16xf32>
    %80 = arith.addf %67, %79 : vector<32x16xf32>
    %cst_31 = arith.constant 0.0152111109 : f32
    %81 = vector.broadcast %cst_31 : f32 to vector<32x128xf32>
    %82 = arith.cmpf ole, %45, %81 : vector<32x128xf32>
    %83 = arith.extui %82 : vector<32x128xi1> to vector<32x128xi32>
    %84 = arith.sitofp %83 : vector<32x128xi32> to vector<32x128xf32>
    %85 = arith.truncf %84 : vector<32x128xf32> to vector<32x128xbf16>
    %cst_32 = arith.constant dense<0.000000e+00> : vector<32x16xf32>
    %86 = tpu.matmul %85, %46, %cst_32 {dimension_numbers = #tpu.dot_dimension_numbers<[1], [0], [0], [1], [0, 0, 1, 1], [], []>} : vector<32x128xbf16>, vector<128x16xbf16>, vector<32x16xf32> -> vector<32x16xf32>
    %c2_i32 = arith.constant 2 : i32
    %87 = vector.broadcast %c2_i32 : i32 to vector<1x16xi32>
    %88 = arith.cmpi eq, %47, %87 : vector<1x16xi32>
    %89 = arith.extui %88 : vector<1x16xi1> to vector<1x16xi32>
    %90 = arith.sitofp %89 : vector<1x16xi32> to vector<1x16xf32>
    %91 = vector.broadcast %90 : vector<1x16xf32> to vector<32x16xf32>
    %92 = arith.mulf %86, %91 : vector<32x16xf32>
    %93 = arith.addf %80, %92 : vector<32x16xf32>
    %cst_33 = arith.constant 2.560000e-02 : f32
    %94 = vector.broadcast %cst_33 : f32 to vector<32x128xf32>
    %95 = arith.cmpf ole, %45, %94 : vector<32x128xf32>
    %96 = arith.extui %95 : vector<32x128xi1> to vector<32x128xi32>
    %97 = arith.sitofp %96 : vector<32x128xi32> to vector<32x128xf32>
    %98 = arith.truncf %97 : vector<32x128xf32> to vector<32x128xbf16>
    %cst_34 = arith.constant dense<0.000000e+00> : vector<32x16xf32>
    %99 = tpu.matmul %98, %46, %cst_34 {dimension_numbers = #tpu.dot_dimension_numbers<[1], [0], [0], [1], [0, 0, 1, 1], [], []>} : vector<32x128xbf16>, vector<128x16xbf16>, vector<32x16xf32> -> vector<32x16xf32>
    %c3_i32 = arith.constant 3 : i32
    %100 = vector.broadcast %c3_i32 : i32 to vector<1x16xi32>
    %101 = arith.cmpi eq, %47, %100 : vector<1x16xi32>
    %102 = arith.extui %101 : vector<1x16xi1> to vector<1x16xi32>
    %103 = arith.sitofp %102 : vector<1x16xi32> to vector<1x16xf32>
    %104 = vector.broadcast %103 : vector<1x16xf32> to vector<32x16xf32>
    %105 = arith.mulf %99, %104 : vector<32x16xf32>
    %106 = arith.addf %93, %105 : vector<32x16xf32>
    %cst_35 = arith.constant 0.0386777781 : f32
    %107 = vector.broadcast %cst_35 : f32 to vector<32x128xf32>
    %108 = arith.cmpf ole, %45, %107 : vector<32x128xf32>
    %109 = arith.extui %108 : vector<32x128xi1> to vector<32x128xi32>
    %110 = arith.sitofp %109 : vector<32x128xi32> to vector<32x128xf32>
    %111 = arith.truncf %110 : vector<32x128xf32> to vector<32x128xbf16>
    %cst_36 = arith.constant dense<0.000000e+00> : vector<32x16xf32>
    %112 = tpu.matmul %111, %46, %cst_36 {dimension_numbers = #tpu.dot_dimension_numbers<[1], [0], [0], [1], [0, 0, 1, 1], [], []>} : vector<32x128xbf16>, vector<128x16xbf16>, vector<32x16xf32> -> vector<32x16xf32>
    %c4_i32 = arith.constant 4 : i32
    %113 = vector.broadcast %c4_i32 : i32 to vector<1x16xi32>
    %114 = arith.cmpi eq, %47, %113 : vector<1x16xi32>
    %115 = arith.extui %114 : vector<1x16xi1> to vector<1x16xi32>
    %116 = arith.sitofp %115 : vector<1x16xi32> to vector<1x16xf32>
    %117 = vector.broadcast %116 : vector<1x16xf32> to vector<32x16xf32>
    %118 = arith.mulf %112, %117 : vector<32x16xf32>
    %119 = arith.addf %106, %118 : vector<32x16xf32>
    %cst_37 = arith.constant 0.0544444434 : f32
    %120 = vector.broadcast %cst_37 : f32 to vector<32x128xf32>
    %121 = arith.cmpf ole, %45, %120 : vector<32x128xf32>
    %122 = arith.extui %121 : vector<32x128xi1> to vector<32x128xi32>
    %123 = arith.sitofp %122 : vector<32x128xi32> to vector<32x128xf32>
    %124 = arith.truncf %123 : vector<32x128xf32> to vector<32x128xbf16>
    %cst_38 = arith.constant dense<0.000000e+00> : vector<32x16xf32>
    %125 = tpu.matmul %124, %46, %cst_38 {dimension_numbers = #tpu.dot_dimension_numbers<[1], [0], [0], [1], [0, 0, 1, 1], [], []>} : vector<32x128xbf16>, vector<128x16xbf16>, vector<32x16xf32> -> vector<32x16xf32>
    %c5_i32 = arith.constant 5 : i32
    %126 = vector.broadcast %c5_i32 : i32 to vector<1x16xi32>
    %127 = arith.cmpi eq, %47, %126 : vector<1x16xi32>
    %128 = arith.extui %127 : vector<1x16xi1> to vector<1x16xi32>
    %129 = arith.sitofp %128 : vector<1x16xi32> to vector<1x16xf32>
    %130 = vector.broadcast %129 : vector<1x16xf32> to vector<32x16xf32>
    %131 = arith.mulf %125, %130 : vector<32x16xf32>
    %132 = arith.addf %119, %131 : vector<32x16xf32>
    %cst_39 = arith.constant 7.290000e-02 : f32
    %133 = vector.broadcast %cst_39 : f32 to vector<32x128xf32>
    %134 = arith.cmpf ole, %45, %133 : vector<32x128xf32>
    %135 = arith.extui %134 : vector<32x128xi1> to vector<32x128xi32>
    %136 = arith.sitofp %135 : vector<32x128xi32> to vector<32x128xf32>
    %137 = arith.truncf %136 : vector<32x128xf32> to vector<32x128xbf16>
    %cst_40 = arith.constant dense<0.000000e+00> : vector<32x16xf32>
    %138 = tpu.matmul %137, %46, %cst_40 {dimension_numbers = #tpu.dot_dimension_numbers<[1], [0], [0], [1], [0, 0, 1, 1], [], []>} : vector<32x128xbf16>, vector<128x16xbf16>, vector<32x16xf32> -> vector<32x16xf32>
    %c6_i32 = arith.constant 6 : i32
    %139 = vector.broadcast %c6_i32 : i32 to vector<1x16xi32>
    %140 = arith.cmpi eq, %47, %139 : vector<1x16xi32>
    %141 = arith.extui %140 : vector<1x16xi1> to vector<1x16xi32>
    %142 = arith.sitofp %141 : vector<1x16xi32> to vector<1x16xf32>
    %143 = vector.broadcast %142 : vector<1x16xf32> to vector<32x16xf32>
    %144 = arith.mulf %138, %143 : vector<32x16xf32>
    %145 = arith.addf %132, %144 : vector<32x16xf32>
    %cst_41 = arith.constant 0.0940444469 : f32
    %146 = vector.broadcast %cst_41 : f32 to vector<32x128xf32>
    %147 = arith.cmpf ole, %45, %146 : vector<32x128xf32>
    %148 = arith.extui %147 : vector<32x128xi1> to vector<32x128xi32>
    %149 = arith.sitofp %148 : vector<32x128xi32> to vector<32x128xf32>
    %150 = arith.truncf %149 : vector<32x128xf32> to vector<32x128xbf16>
    %cst_42 = arith.constant dense<0.000000e+00> : vector<32x16xf32>
    %151 = tpu.matmul %150, %46, %cst_42 {dimension_numbers = #tpu.dot_dimension_numbers<[1], [0], [0], [1], [0, 0, 1, 1], [], []>} : vector<32x128xbf16>, vector<128x16xbf16>, vector<32x16xf32> -> vector<32x16xf32>
    %c7_i32 = arith.constant 7 : i32
    %152 = vector.broadcast %c7_i32 : i32 to vector<1x16xi32>
    %153 = arith.cmpi eq, %47, %152 : vector<1x16xi32>
    %154 = arith.extui %153 : vector<1x16xi1> to vector<1x16xi32>
    %155 = arith.sitofp %154 : vector<1x16xi32> to vector<1x16xf32>
    %156 = vector.broadcast %155 : vector<1x16xf32> to vector<32x16xf32>
    %157 = arith.mulf %151, %156 : vector<32x16xf32>
    %158 = arith.addf %145, %157 : vector<32x16xf32>
    %cst_43 = arith.constant 0.117877781 : f32
    %159 = vector.broadcast %cst_43 : f32 to vector<32x128xf32>
    %160 = arith.cmpf ole, %45, %159 : vector<32x128xf32>
    %161 = arith.extui %160 : vector<32x128xi1> to vector<32x128xi32>
    %162 = arith.sitofp %161 : vector<32x128xi32> to vector<32x128xf32>
    %163 = arith.truncf %162 : vector<32x128xf32> to vector<32x128xbf16>
    %cst_44 = arith.constant dense<0.000000e+00> : vector<32x16xf32>
    %164 = tpu.matmul %163, %46, %cst_44 {dimension_numbers = #tpu.dot_dimension_numbers<[1], [0], [0], [1], [0, 0, 1, 1], [], []>} : vector<32x128xbf16>, vector<128x16xbf16>, vector<32x16xf32> -> vector<32x16xf32>
    %c8_i32 = arith.constant 8 : i32
    %165 = vector.broadcast %c8_i32 : i32 to vector<1x16xi32>
    %166 = arith.cmpi eq, %47, %165 : vector<1x16xi32>
    %167 = arith.extui %166 : vector<1x16xi1> to vector<1x16xi32>
    %168 = arith.sitofp %167 : vector<1x16xi32> to vector<1x16xf32>
    %169 = vector.broadcast %168 : vector<1x16xf32> to vector<32x16xf32>
    %170 = arith.mulf %164, %169 : vector<32x16xf32>
    %171 = arith.addf %158, %170 : vector<32x16xf32>
    %cst_45 = arith.constant 1.444000e-01 : f32
    %172 = vector.broadcast %cst_45 : f32 to vector<32x128xf32>
    %173 = arith.cmpf ole, %45, %172 : vector<32x128xf32>
    %174 = arith.extui %173 : vector<32x128xi1> to vector<32x128xi32>
    %175 = arith.sitofp %174 : vector<32x128xi32> to vector<32x128xf32>
    %176 = arith.truncf %175 : vector<32x128xf32> to vector<32x128xbf16>
    %cst_46 = arith.constant dense<0.000000e+00> : vector<32x16xf32>
    %177 = tpu.matmul %176, %46, %cst_46 {dimension_numbers = #tpu.dot_dimension_numbers<[1], [0], [0], [1], [0, 0, 1, 1], [], []>} : vector<32x128xbf16>, vector<128x16xbf16>, vector<32x16xf32> -> vector<32x16xf32>
    %c9_i32 = arith.constant 9 : i32
    %178 = vector.broadcast %c9_i32 : i32 to vector<1x16xi32>
    %179 = arith.cmpi eq, %47, %178 : vector<1x16xi32>
    %180 = arith.extui %179 : vector<1x16xi1> to vector<1x16xi32>
    %181 = arith.sitofp %180 : vector<1x16xi32> to vector<1x16xf32>
    %182 = vector.broadcast %181 : vector<1x16xf32> to vector<32x16xf32>
    %183 = arith.mulf %177, %182 : vector<32x16xf32>
    %184 = arith.addf %171, %183 : vector<32x16xf32>
    %cst_47 = arith.constant 0.173611104 : f32
    %185 = vector.broadcast %cst_47 : f32 to vector<32x128xf32>
    %186 = arith.cmpf ole, %45, %185 : vector<32x128xf32>
    %187 = arith.extui %186 : vector<32x128xi1> to vector<32x128xi32>
    %188 = arith.sitofp %187 : vector<32x128xi32> to vector<32x128xf32>
    %189 = arith.truncf %188 : vector<32x128xf32> to vector<32x128xbf16>
    %cst_48 = arith.constant dense<0.000000e+00> : vector<32x16xf32>
    %190 = tpu.matmul %189, %46, %cst_48 {dimension_numbers = #tpu.dot_dimension_numbers<[1], [0], [0], [1], [0, 0, 1, 1], [], []>} : vector<32x128xbf16>, vector<128x16xbf16>, vector<32x16xf32> -> vector<32x16xf32>
    %c10_i32 = arith.constant 10 : i32
    %191 = vector.broadcast %c10_i32 : i32 to vector<1x16xi32>
    %192 = arith.cmpi eq, %47, %191 : vector<1x16xi32>
    %193 = arith.extui %192 : vector<1x16xi1> to vector<1x16xi32>
    %194 = arith.sitofp %193 : vector<1x16xi32> to vector<1x16xf32>
    %195 = vector.broadcast %194 : vector<1x16xf32> to vector<32x16xf32>
    %196 = arith.mulf %190, %195 : vector<32x16xf32>
    %197 = arith.addf %184, %196 : vector<32x16xf32>
    %cst_49 = arith.constant 0.205511108 : f32
    %198 = vector.broadcast %cst_49 : f32 to vector<32x128xf32>
    %199 = arith.cmpf ole, %45, %198 : vector<32x128xf32>
    %200 = arith.extui %199 : vector<32x128xi1> to vector<32x128xi32>
    %201 = arith.sitofp %200 : vector<32x128xi32> to vector<32x128xf32>
    %202 = arith.truncf %201 : vector<32x128xf32> to vector<32x128xbf16>
    %cst_50 = arith.constant dense<0.000000e+00> : vector<32x16xf32>
    %203 = tpu.matmul %202, %46, %cst_50 {dimension_numbers = #tpu.dot_dimension_numbers<[1], [0], [0], [1], [0, 0, 1, 1], [], []>} : vector<32x128xbf16>, vector<128x16xbf16>, vector<32x16xf32> -> vector<32x16xf32>
    %c11_i32 = arith.constant 11 : i32
    %204 = vector.broadcast %c11_i32 : i32 to vector<1x16xi32>
    %205 = arith.cmpi eq, %47, %204 : vector<1x16xi32>
    %206 = arith.extui %205 : vector<1x16xi1> to vector<1x16xi32>
    %207 = arith.sitofp %206 : vector<1x16xi32> to vector<1x16xf32>
    %208 = vector.broadcast %207 : vector<1x16xf32> to vector<32x16xf32>
    %209 = arith.mulf %203, %208 : vector<32x16xf32>
    %210 = arith.addf %197, %209 : vector<32x16xf32>
    %cst_51 = arith.constant 2.401000e-01 : f32
    %211 = vector.broadcast %cst_51 : f32 to vector<32x128xf32>
    %212 = arith.cmpf ole, %45, %211 : vector<32x128xf32>
    %213 = arith.extui %212 : vector<32x128xi1> to vector<32x128xi32>
    %214 = arith.sitofp %213 : vector<32x128xi32> to vector<32x128xf32>
    %215 = arith.truncf %214 : vector<32x128xf32> to vector<32x128xbf16>
    %cst_52 = arith.constant dense<0.000000e+00> : vector<32x16xf32>
    %216 = tpu.matmul %215, %46, %cst_52 {dimension_numbers = #tpu.dot_dimension_numbers<[1], [0], [0], [1], [0, 0, 1, 1], [], []>} : vector<32x128xbf16>, vector<128x16xbf16>, vector<32x16xf32> -> vector<32x16xf32>
    %c12_i32 = arith.constant 12 : i32
    %217 = vector.broadcast %c12_i32 : i32 to vector<1x16xi32>
    %218 = arith.cmpi eq, %47, %217 : vector<1x16xi32>
    %219 = arith.extui %218 : vector<1x16xi1> to vector<1x16xi32>
    %220 = arith.sitofp %219 : vector<1x16xi32> to vector<1x16xf32>
    %221 = vector.broadcast %220 : vector<1x16xf32> to vector<32x16xf32>
    %222 = arith.mulf %216, %221 : vector<32x16xf32>
    %223 = arith.addf %210, %222 : vector<32x16xf32>
    %cst_53 = arith.constant 0.277377784 : f32
    %224 = vector.broadcast %cst_53 : f32 to vector<32x128xf32>
    %225 = arith.cmpf ole, %45, %224 : vector<32x128xf32>
    %226 = arith.extui %225 : vector<32x128xi1> to vector<32x128xi32>
    %227 = arith.sitofp %226 : vector<32x128xi32> to vector<32x128xf32>
    %228 = arith.truncf %227 : vector<32x128xf32> to vector<32x128xbf16>
    %cst_54 = arith.constant dense<0.000000e+00> : vector<32x16xf32>
    %229 = tpu.matmul %228, %46, %cst_54 {dimension_numbers = #tpu.dot_dimension_numbers<[1], [0], [0], [1], [0, 0, 1, 1], [], []>} : vector<32x128xbf16>, vector<128x16xbf16>, vector<32x16xf32> -> vector<32x16xf32>
    %c13_i32 = arith.constant 13 : i32
    %230 = vector.broadcast %c13_i32 : i32 to vector<1x16xi32>
    %231 = arith.cmpi eq, %47, %230 : vector<1x16xi32>
    %232 = arith.extui %231 : vector<1x16xi1> to vector<1x16xi32>
    %233 = arith.sitofp %232 : vector<1x16xi32> to vector<1x16xf32>
    %234 = vector.broadcast %233 : vector<1x16xf32> to vector<32x16xf32>
    %235 = arith.mulf %229, %234 : vector<32x16xf32>
    %236 = arith.addf %223, %235 : vector<32x16xf32>
    %cst_55 = arith.constant 0.317344457 : f32
    %237 = vector.broadcast %cst_55 : f32 to vector<32x128xf32>
    %238 = arith.cmpf ole, %45, %237 : vector<32x128xf32>
    %239 = arith.extui %238 : vector<32x128xi1> to vector<32x128xi32>
    %240 = arith.sitofp %239 : vector<32x128xi32> to vector<32x128xf32>
    %241 = arith.truncf %240 : vector<32x128xf32> to vector<32x128xbf16>
    %cst_56 = arith.constant dense<0.000000e+00> : vector<32x16xf32>
    %242 = tpu.matmul %241, %46, %cst_56 {dimension_numbers = #tpu.dot_dimension_numbers<[1], [0], [0], [1], [0, 0, 1, 1], [], []>} : vector<32x128xbf16>, vector<128x16xbf16>, vector<32x16xf32> -> vector<32x16xf32>
    %c14_i32 = arith.constant 14 : i32
    %243 = vector.broadcast %c14_i32 : i32 to vector<1x16xi32>
    %244 = arith.cmpi eq, %47, %243 : vector<1x16xi32>
    %245 = arith.extui %244 : vector<1x16xi1> to vector<1x16xi32>
    %246 = arith.sitofp %245 : vector<1x16xi32> to vector<1x16xf32>
    %247 = vector.broadcast %246 : vector<1x16xf32> to vector<32x16xf32>
    %248 = arith.mulf %242, %247 : vector<32x16xf32>
    %249 = arith.addf %236, %248 : vector<32x16xf32>
    %cst_57 = arith.constant 3.600000e-01 : f32
    %250 = vector.broadcast %cst_57 : f32 to vector<32x128xf32>
    %251 = arith.cmpf ole, %45, %250 : vector<32x128xf32>
    %252 = arith.extui %251 : vector<32x128xi1> to vector<32x128xi32>
    %253 = arith.sitofp %252 : vector<32x128xi32> to vector<32x128xf32>
    %254 = arith.truncf %253 : vector<32x128xf32> to vector<32x128xbf16>
    %cst_58 = arith.constant dense<0.000000e+00> : vector<32x16xf32>
    %255 = tpu.matmul %254, %46, %cst_58 {dimension_numbers = #tpu.dot_dimension_numbers<[1], [0], [0], [1], [0, 0, 1, 1], [], []>} : vector<32x128xbf16>, vector<128x16xbf16>, vector<32x16xf32> -> vector<32x16xf32>
    %c15_i32 = arith.constant 15 : i32
    %256 = vector.broadcast %c15_i32 : i32 to vector<1x16xi32>
    %257 = arith.cmpi eq, %47, %256 : vector<1x16xi32>
    %258 = arith.extui %257 : vector<1x16xi1> to vector<1x16xi32>
    %259 = arith.sitofp %258 : vector<1x16xi32> to vector<1x16xf32>
    %260 = vector.broadcast %259 : vector<1x16xf32> to vector<32x16xf32>
    %261 = arith.mulf %255, %260 : vector<32x16xf32>
    %262 = arith.addf %249, %261 : vector<32x16xf32>
    %c0_59 = arith.constant 0 : index
    %c0_60 = arith.constant 0 : index
    %263 = vector.load %arg16[%c0_59, %c0_60] : memref<32x16xf32, #tpu.memory_space<vmem>>, vector<32x16xf32>
    %264 = arith.addf %263, %262 : vector<32x16xf32>
    %c0_61 = arith.constant 0 : index
    %c0_62 = arith.constant 0 : index
    %265 = vector.load %arg16[%c0_61, %c0_62] : memref<32x16xf32, #tpu.memory_space<vmem>>, vector<32x16xf32>
    tpu.vector_store %arg16[%c0_61, %c0_62], %264 {strides = array<i32>} : memref<32x16xf32, #tpu.memory_space<vmem>>, vector<32x16xf32>,
    %266 = arith.extui %34 : vector<32x128xi1> to vector<32x128xi8>
    %c0_63 = arith.constant 0 : index
    %c0_64 = arith.constant 0 : index
    %267 = vector.load %arg15[%c0_63, %c0_64] : memref<32x128xi8, #tpu.memory_space<vmem>>, vector<32x128xi8>
    tpu.vector_store %arg15[%c0_63, %c0_64], %266 {strides = array<i32>} : memref<32x128xi8, #tpu.memory_space<vmem>>, vector<32x128xi8>,
    %c0_i32_65 = arith.constant 0 : i32
    %268 = arith.cmpi eq, %arg1, %c0_i32_65 : i32
    %269 = arith.extui %268 : i1 to i32
    %c0_i32_66 = arith.constant 0 : i32
    %270 = arith.cmpi ne, %269, %c0_i32_66 : i32
    scf.if %270 {
      %c0_67 = arith.constant 0 : index
      %c0_68 = arith.constant 0 : index
      %271 = vector.load %arg17[%c0_67, %c0_68] : memref<32x1xf32, #tpu.memory_space<vmem>>, vector<32x1xf32>
      %cst_69 = arith.constant 1.000000e+00 : f32
      %272 = vector.broadcast %cst_69 : f32 to vector<32x1xf32>
      %273 = arith.maximumf %271, %272 : vector<32x1xf32>
      %c0_70 = arith.constant 0 : index
      %c0_71 = arith.constant 0 : index
      %274 = vector.load %arg16[%c0_70, %c0_71] : memref<32x16xf32, #tpu.memory_space<vmem>>, vector<32x16xf32>
      %275 = vector.broadcast %273 : vector<32x1xf32> to vector<32x16xf32>
      %276 = arith.divf %274, %275 : vector<32x16xf32>
      %277 = tpu.concatenate %276, %274 in 1 : vector<32x16xf32>, vector<32x16xf32> -> vector<32x32xf32>
      %c0_72 = arith.constant 0 : index
      %c0_73 = arith.constant 0 : index
      %278 = vector.load %arg14[%c0_72, %c0_73] : memref<32x32xf32, #tpu.memory_space<vmem>>, vector<32x32xf32>
      tpu.vector_store %arg14[%c0_72, %c0_73], %277 {strides = array<i32>} : memref<32x32xf32, #tpu.memory_space<vmem>>, vector<32x32xf32>,
      %c0_74 = arith.constant 0 : index
      %c0_75 = arith.constant 0 : index
      %279 = vector.load %arg11[%c0_74, %c0_75] : memref<32x2xf32, #tpu.memory_space<vmem>>, vector<32x2xf32>
      %cst_76 = arith.constant dense<0.000000e+00> : vector<32x2xf32>
      %280 = tpu.matmul %277, %279, %cst_76 {dimension_numbers = #tpu.dot_dimension_numbers<[1], [0], [0], [1], [0, 0, 1, 1], [], []>} : vector<32x32xf32>, vector<32x2xf32>, vector<32x2xf32> -> vector<32x2xf32>
      %c0_77 = arith.constant 0 : index
      %c0_78 = arith.constant 0 : index
      %281 = vector.load %arg12[%c0_77, %c0_78] : memref<1x2xf32, #tpu.memory_space<vmem>>, vector<1x2xf32>
      %282 = vector.broadcast %281 : vector<1x2xf32> to vector<32x2xf32>
      %283 = arith.addf %280, %282 : vector<32x2xf32>
      %c0_79 = arith.constant 0 : index
      %c0_80 = arith.constant 0 : index
      %284 = vector.load %arg13[%c0_79, %c0_80] : memref<32x2xf32, #tpu.memory_space<vmem>>, vector<32x2xf32>
      tpu.vector_store %arg13[%c0_79, %c0_80], %283 {strides = array<i32>} : memref<32x2xf32, #tpu.memory_space<vmem>>, vector<32x2xf32>,
    } else {
    }
    return
  }
  func.func @transform_0(%arg0: i32, %arg1: i32) -> (i32, i32) {
    %c0_i32 = arith.constant 0 : i32
    %c0_i32_0 = arith.constant 0 : i32
    return %arg0, %c0_i32 : i32, i32
  }
  func.func @transform_1(%arg0: i32, %arg1: i32) -> (i32, i32) {
    %c0_i32 = arith.constant 0 : i32
    %c0_i32_0 = arith.constant 0 : i32
    return %arg0, %c0_i32 : i32, i32
  }
  func.func @transform_2(%arg0: i32, %arg1: i32) -> (i32, i32) {
    %c0_i32 = arith.constant 0 : i32
    %c0_i32_0 = arith.constant 0 : i32
    return %c0_i32, %arg1 : i32, i32
  }
  func.func @transform_3(%arg0: i32, %arg1: i32) -> (i32, i32) {
    %c0_i32 = arith.constant 0 : i32
    %c0_i32_0 = arith.constant 0 : i32
    return %c0_i32, %arg1 : i32, i32
  }
  func.func @transform_4(%arg0: i32, %arg1: i32) -> (i32, i32) {
    %c0_i32 = arith.constant 0 : i32
    %c0_i32_0 = arith.constant 0 : i32
    return %arg0, %c0_i32 : i32, i32
  }
  func.func @transform_5(%arg0: i32, %arg1: i32) -> (i32, i32) {
    %c0_i32 = arith.constant 0 : i32
    %c0_i32_0 = arith.constant 0 : i32
    return %c0_i32, %arg1 : i32, i32
  }
  func.func @transform_6(%arg0: i32, %arg1: i32) -> (i32, i32) {
    %c0_i32 = arith.constant 0 : i32
    %c0_i32_0 = arith.constant 0 : i32
    return %arg0, %c0_i32 : i32, i32
  }
  func.func @transform_7(%arg0: i32, %arg1: i32) -> (i32, i32) {
    %c0_i32 = arith.constant 0 : i32
    %c0_i32_0 = arith.constant 0 : i32
    return %c0_i32, %arg1 : i32, i32
  }
  func.func @transform_8(%arg0: i32, %arg1: i32) -> (i32, i32) {
    %c0_i32 = arith.constant 0 : i32
    %c0_i32_0 = arith.constant 0 : i32
    %c0_i32_1 = arith.constant 0 : i32
    return %c0_i32, %c0_i32_0 : i32, i32
  }
  func.func @transform_9(%arg0: i32, %arg1: i32) -> (i32, i32) {
    %c0_i32 = arith.constant 0 : i32
    %c0_i32_0 = arith.constant 0 : i32
    %c0_i32_1 = arith.constant 0 : i32
    return %c0_i32, %c0_i32_0 : i32, i32
  }
  func.func @transform_10(%arg0: i32, %arg1: i32) -> (i32, i32) {
    %c0_i32 = arith.constant 0 : i32
    %c0_i32_0 = arith.constant 0 : i32
    %c0_i32_1 = arith.constant 0 : i32
    return %c0_i32, %c0_i32_0 : i32, i32
  }
  func.func @transform_11(%arg0: i32, %arg1: i32) -> (i32, i32) {
    %c0_i32 = arith.constant 0 : i32
    %c0_i32_0 = arith.constant 0 : i32
    return %arg0, %c0_i32 : i32, i32
  }
  func.func @transform_12(%arg0: i32, %arg1: i32) -> (i32, i32) {
    %c0_i32 = arith.constant 0 : i32
    %c0_i32_0 = arith.constant 0 : i32
    return %arg0, %c0_i32 : i32, i32
  }
  func.func @transform_13(%arg0: i32, %arg1: i32) -> (i32, i32) {
    %c0_i32 = arith.constant 0 : i32
    return %arg0, %arg1 : i32, i32
  }
}

</mosaic_0001>

<bundles_post_ra>
// kernel: tpu_custom_call.1
= control target key start
LH: loop header
LB: loop body
LE: loop exit
PB: predicated region body
PF: predicated region fallthrough
CT: control target
= control target key end

     0   :  { %19 = vsyncpa [#allocation5], 0  ;;  %vm3644_vm0 = vcmask 261120   ;;  %v2738_v3 = vmov 1   ;;  %v2739_v15 = vmov 2   ;;  %v2740_v17 = vmov 0   ;;  %s3630_s0 = inlined_call_operand.vmem [shape: f32[32,32], index: 0, kind: input, shape index: {}]   ;;  %s3631_s1 = inlined_call_operand.vmem [shape: f32[32,1], index: 1, kind: input, shape index: {}]   ;;  %s3632_s2 = inlined_call_operand.vmem [shape: f32[32,128], index: 2, kind: input, shape index: {}]   ;;  %s3633_s3 = inlined_call_operand.vmem [shape: f32[1,128], index: 3, kind: input, shape index: {}]   ;;  %s3634_s4 = inlined_call_operand.vmem [shape: f32[32,3], index: 4, kind: input, shape index: {}]   ;;  %s3635_s5 = inlined_call_operand.vmem [shape: f32[3,128], index: 5, kind: input, shape index: {}]   ;;  %s3636_s6 = inlined_call_operand.vmem [shape: f32[32,1], index: 6, kind: input, shape index: {}]   ;;  %s3637_s7 = inlined_call_operand.vmem [shape: f32[1,128], index: 7, kind: input, shape index: {}]   ;;  %s3638_s8 = inlined_call_operand.vmem [shape: bf16[128,16], index: 8, kind: input, shape index: {}]   ;;  %s3639_s9 = inlined_call_operand.vmem [shape: f32[32,2], index: 9, kind: input, shape index: {}]   ;;  %s3640_s10 = inlined_call_operand.vmem [shape: f32[1,2], index: 10, kind: input, shape index: {}]   ;;  %s3641_s11 = inlined_call_operand.vmem [shape: f32[32,2], index: 11, kind: output, shape index: {0}]   ;;  %s3642_s12 = inlined_call_operand.hbm [shape: f32[32,32], index: 12, kind: output, shape index: {1}]   ;;  %s3643_s13 = inlined_call_operand.hbm [shape: s8[32,128], index: 13, kind: output, shape index: {2}]  }
   0x1   :  { %v68_v0 = vld [vmem:[%s3634_s4] sm:$0xff]  ;;  %v65_v2 = vld [vmem:[%s3632_s2 + $0x8] sm:$0xff]  ;;  %2658 = vset.pattern.permute.xlu1 %v2738_v3  ;;  %v66_v5 = vld [vmem:[%s3632_s2 + $0x10] sm:$0xff]  ;;  %2660 = vset.pattern.permute.xlu0 %v2738_v3 }
   0x2   :  { %v64_v1 = vld [vmem:[%s3632_s2] sm:$0xff]  ;;  %v67_v6 = vld [vmem:[%s3632_s2 + $0x18] sm:$0xff]  ;;  %106 = vperm.xlu1 %2658, %v68_v0   ;;  %v69_v9 = vld [vmem:[%s3634_s4 + $0x8] sm:$0xff] }
   0x3   :  { %v2632_v4 = vpack.c.bf16 %v65_v2, %v64_v1  ;;  %v2636_v7 = vpack.c.bf16 %v67_v6, %v66_v5  ;;  %v60_v8 = vld [vmem:[%s3630_s0] sm:$0xff]  ;;  %v70_v10 = vld [vmem:[%s3634_s4 + $0x10] sm:$0xff]  ;;  %v71_v11 = vld [vmem:[%s3634_s4 + $0x18] sm:$0xff] }
   0x4   :  { %2272 = vmatprep.mubr.msk.f32.mxu0 %vm3644_vm0, %v60_v8  ;;  %114 = vperm.xlu0 %2660, %v70_v10   ;;  %v61_v12 = vld [vmem:[%s3630_s0 + $0x8] sm:$0xff]  ;;  %v62_v13 = vld [vmem:[%s3630_s0 + $0x10] sm:$0xff]  ;;  %v2855_v14 = vld [vmem:[%s3638_s8] sm:$0xff]  }
   0x5   :  { %2633 = vmatprep.subr.bf16.mxu0 %v2632_v4  ;;  %v2860_v16 = vld [vmem:[%s3638_s8 + $0x8] sm:$0xff]   ;;  %2278 = vmatprep.subr.bf16.mxu1 %v2855_v14  ;;  %v63_v18 = vld [vmem:[%s3630_s0 + $0x18] sm:$0xff]  ;;  %v2875_v19 = vld [vmem:[%s3638_s8 + $0x10] sm:$0xff]  }
   0x6   :  { %2635 = vmatpush3.bf16.msra.mxu0 %v2632_v4  ;;  %110 = vperm.xlu1 %2658, %v69_v9  }
   0x7   :  { %2637 = vmatprep.subr.bf16.mxu0 %v2636_v7  ;;  %2279 = vmatpush3.bf16.msra.mxu1 %v2855_v14 }
   0x8   :  { %2663 = vset.pattern.permute.xlu0 %v2739_v15  ;;  %2280 = vmatprep.subr.bf16.mxu1 %v2860_v16 }
   0x9   :  { %142 = vperm.xlu0 %2663, %v69_v9  }
   0xa   :  { %2639 = vmatpush3.bf16.msra.mxu0 %v2636_v7  ;;  %2659 = vset.pattern.permute.xlu1 %v2740_v17 }
   0xb   :  { %90 = vperm.xlu1 %2659, %v71_v11   ;;  %2298 = vmatprep.subr.bf16.mxu0 %v2855_v14 }
   0xd   :  { %2273 = vmatmul.mubr.msk.f32.vlgmr.msra.gmra.mrb[0].mxu0 %vm3644_vm0, %v61_v12  ;;  %2664 = vset.pattern.permute.xlu0 %v2740_v17 }
   0xe   :  { %2275 = vmatprep.mubr.msk.f32.mxu0 %vm3644_vm0, %v62_v13 }
   0xf   :  { %20 = vsyncpa [#allocation7], 0  ;;  %75 = vperm.xlu0 %2664, %v68_v0   ;;  %2281 = vmatpush3.bf16.msra.mxu1 %v2860_v16  ;;  %v2886_v20 = vld [vmem:[%s3638_s8 + $0x18] sm:$0xff]   ;;  %v169_v21 = vld [vmem:[%s3636_s6] sm:$0xff]  ;;  %v93_v33 = vlaneseq }
  0x10   :  { %2661 = vset.pattern.permute.xlu1 %v2738_v3  ;;  %2282 = vmatprep.subr.bf16.mxu1 %v2875_v19  ;;  %v2897_v22 = vld [vmem:[%s3638_s8 + $0x20] sm:$0xff]   ;;  %v172_v23 = vld [vmem:[%s3636_s6 + $0x18] sm:$0xff]  ;;  %v2909_v24 = vld [vmem:[%s3638_s8 + $0x28] sm:$0xff]  }
  0x11   :  { %2276 = vmatmul.mubr.msk.f32.gmra.mrb[2].mxu0 %vm3644_vm0, %v63_v18  ;;  %118 = vperm.xlu1 %2661, %v71_v11   ;;  %v170_v25 = vld [vmem:[%s3636_s6 + $0x8] sm:$0xff]  ;;  %v2924_v27 = vld [vmem:[%s3638_s8 + $0x30] sm:$0xff]   ;;  %v2933_v28 = vld [vmem:[%s3638_s8 + $0x38] sm:$0xff]   ;;  %v94_v35 = vshrl.u32 %v93_v33, 7 }
  0x12   :  { %2299 = vmatpush3.bf16.msra.mxu0 %v2855_v14  ;;  %v213_v26 = vld [vmem:[%s3631_s1 + $0x8] sm:$0xff]  ;;  %v171_v29 = vld [vmem:[%s3636_s6 + $0x10] sm:$0xff]  ;;  %v215_v30 = vld [vmem:[%s3631_s1 + $0x18] sm:$0xff] }
  0x13   :  { %80 = vperm.xlu0 %2664, %v69_v9   ;;  %2283 = vmatpush3.bf16.msra.mxu1 %v2875_v19  ;;  %v212_v31 = vld [vmem:[%s3631_s1] sm:$0xff]  ;;  %v214_v32 = vld [vmem:[%s3631_s1 + $0x10] sm:$0xff]  ;;  %v123_v38 = vsub.s32 1, %v94_v35  ;;  %v95_v39 = vsub.s32 0, %v94_v35  ;;  %v155_v45 = vsub.s32 2, %v94_v35 }
  0x14   :  { %2300 = vmatprep.subr.bf16.mxu0 %v2860_v16  ;;  %2284 = vmatprep.subr.bf16.mxu1 %v2886_v20  ;;  %v72_v40 = vld [vmem:[%s3635_s5] sm:$0x7] }
  0x15   :  { %2662 = vset.pattern.permute.xlu1 %v2739_v15  ;;  %v124_v43 = vrot.slane %v72_v40, %v123_v38  ;;  %v96_v44 = vrot.slane %v72_v40, %v95_v39  ;;  %v156_v51 = vrot.slane %v72_v40, %v155_v45  ;;  %v2741_v40 = vmov 1.0|1.0  }
  0x16   :  { %138 = vperm.xlu1 %2662, %v68_v0   ;;  %2301 = vmatpush3.bf16.msra.mxu0 %v2860_v16 }
  0x17   :  { %85 = vperm.xlu0 %2664, %v70_v10   ;;  %2285 = vmatpush3.bf16.msra.mxu1 %v2886_v20 }
  0x18   :  { %2302 = vmatprep.subr.bf16.mxu0 %v2875_v19  ;;  %2286 = vmatprep.subr.bf16.mxu1 %v2897_v22 }
  0x1a   :  { %146 = vperm.xlu1 %2662, %v70_v10   ;;  %2303 = vmatpush3.bf16.msra.mxu0 %v2875_v19 }
  0x1b   :  { %176 = vperm.xlu0 %2664, %v169_v21   ;;  %2287 = vmatpush3.bf16.msra.mxu1 %v2897_v22 }
  0x1c   :  { %2304 = vmatprep.subr.bf16.mxu0 %v2886_v20  ;;  %2288 = vmatprep.subr.bf16.mxu1 %v2909_v24 }
  0x1e   :  { %150 = vperm.xlu1 %2662, %v71_v11   ;;  %2305 = vmatpush3.bf16.msra.mxu0 %v2886_v20 }
  0x1f   :  { %191 = vperm.xlu0 %2664, %v172_v23   ;;  %2289 = vmatpush3.bf16.msra.mxu1 %v2909_v24  ;;  %v1907_v23 = vld [vmem:[%s3637_s7] ss:$0 sm:$0xff]  ;;  %s2744_s7 = smov [#allocation4]  }
  0x20   :  { %2306 = vmatprep.subr.bf16.mxu0 %v2897_v22  ;;  %2290 = vmatprep.subr.bf16.mxu1 %v2924_v27  ;;  %s1880_s24 = sshll.u32 %s2744_s7, 4  ;;  %s1881_s24 = int_to_ptr.vmem [resolvable:$true] %s1880_s24 }
  0x21   :  { %p2695_p1 = scmp.lt.s32.totalorder %s1881_s24, %s1881_s24 }
  0x22   :  { %2665 = vset.pattern.permute.xlu1 %v2740_v17  ;;  %2307 = vmatpush3.bf16.msra.mxu0 %v2897_v22 }
  0x23   :  { %181 = vperm.xlu1 %2665, %v170_v25   ;;  %224 = vperm.xlu0 %2664, %v213_v26  }
  0x24   :  { %2291 = vmatpush3.bf16.msra.mxu1 %v2924_v27  ;;  %2308 = vmatprep.subr.bf16.mxu0 %v2909_v24 }
  0x25   :  { %2292 = vmatprep.subr.bf16.mxu1 %v2933_v28 }
  0x26   :  { %2309 = vmatpush3.bf16.msra.mxu0 %v2909_v24 }
  0x27   :  { %186 = vperm.xlu1 %2665, %v171_v29   ;;  %234 = vperm.xlu0 %2664, %v215_v30  }
  0x28   :  { %2293 = vmatpush3.bf16.msra.mxu1 %v2933_v28  ;;  %2310 = vmatprep.subr.bf16.mxu0 %v2924_v27 }
  0x29   :  { %2318 = vmatprep.subr.bf16.mxu1 %v2855_v14 }
  0x2a   :  { %2311 = vmatpush3.bf16.msra.mxu0 %v2924_v27 }
  0x2b   :  { %219 = vperm.xlu1 %2665, %v212_v31   ;;  %2312 = vmatprep.subr.bf16.mxu0 %v2933_v28 }
  0x2e   :  { %2313 = vmatpush3.bf16.msra.mxu0 %v2933_v28 }
  0x2f   :  { %229 = vperm.xlu1 %2665, %v214_v32   ;;  %2338 = vmatprep.subr.bf16.mxu0 %v2855_v14 }
  0x81   :  { %v107_v34 = vpop.permute.xlu1 %106 }
  0x82   :  { %v125_v47 = vsub.f32 %v107_v34, %v124_v43 }
  0x83   :  { %v115_v36 = vpop.permute.xlu0 %114 }
  0x84   :  { %v129_v54 = vmul.f32 %v125_v47, %v125_v47  ;;  %v127_v57 = vsub.f32 %v115_v36, %v124_v43  ;;  %v3700_v36 = vmov 0 }
  0x85   :  { %v111_v37 = vpop.permute.xlu1 %110 }
  0x86   :  { %v126_v50 = vsub.f32 %v111_v37, %v124_v43  ;;  %v131_v4 = vmul.f32 %v127_v57, %v127_v57 }
  0x88   :  { %v143_v41 = vpop.permute.xlu0 %142  ;;  %v130_v56 = vmul.f32 %v126_v50, %v126_v50 }
  0x89   :  { %v158_v58 = vsub.f32 %v143_v41, %v156_v51 }
  0x8a   :  { %v91_v42 = vpop.permute.xlu1 %90 }
  0x8b   :  { %v100_v61 = vsub.f32 %v91_v42, %v96_v44  ;;  %v162_v5 = vmul.f32 %v158_v58, %v158_v58 }
  0x8d   :  { %v104_v9 = vmul.f32 %v100_v61, %v100_v61 }
  0x8e   :  { %v76_v46 = vpop.permute.xlu0 %75 }
  0x8f   :  { %v97_v49 = vsub.f32 %v76_v46, %v96_v44 }
  0x90   :  { %v119_v48 = vpop.permute.xlu1 %118 }
  0x91   :  { %v101_v55 = vmul.f32 %v97_v49, %v97_v49  ;;  %v128_v62 = vsub.f32 %v119_v48, %v124_v43 }
  0x92   :  { %v81_v52 = vpop.permute.xlu0 %80 }
  0x93   :  { %v98_v53 = vsub.f32 %v81_v52, %v96_v44  ;;  %v133_v2 = vadd.f32 %v129_v54, %v101_v55  ;;  %v132_v10 = vmul.f32 %v128_v62, %v128_v62 }
  0x95   :  { %v139_v59 = vpop.permute.xlu1 %138  ;;  %v102_v60 = vmul.f32 %v98_v53, %v98_v53  ;;  %v136_v26 = vadd.f32 %v132_v10, %v104_v9  ;;  %v3666_v9 = vmov 0  ;;  %v3668_v10 = vmov 0 }
  0x96   :  { %v157_v63 = vsub.f32 %v139_v59, %v156_v51  ;;  %v86_v0 = vpop.permute.xlu0 %85 }
  0x97   :  { %v99_v1 = vsub.f32 %v86_v0, %v96_v44  ;;  %v134_v6 = vadd.f32 %v130_v56, %v102_v60  ;;  %v1908_v44 = vld [vmem:[%s3633_s3] ss:$0 sm:$0xff]  ;;  %s2690_s3 = scalar_lea.vmem %s1881_s24, 512 }
  0x98   :  { %v161_v3 = vmul.f32 %v157_v63, %v157_v63  ;;  %p2691_p0 = scmp.ne.s32.totalorder %s1881_s24, %s2690_s3  ;;  %p2696_p2 = scmp.lt.s32.totalorder %s2690_s3, %s2690_s3 }
  0x99   :  { %v147_v7 = vpop.permute.xlu1 %146  ;;  %v103_v8 = vmul.f32 %v99_v1, %v99_v1  ;;  %v166_v25 = vadd.f32 %v162_v5, %v134_v6 }
  0x9a   :  { %v159_v11 = vsub.f32 %v147_v7, %v156_v51  ;;  %v177_v12 = vpop.permute.xlu0 %176  ;;  %v165_v13 = vadd.f32 %v161_v3, %v133_v2  ;;  %p2697_p3 = por %p2696_p2, %p2695_p1 }
  0x9b   :  { %v135_v18 = vadd.f32 %v131_v4, %v103_v8  ;;  %vm200_vm1 = vcmp.eq.f32.partialorder %v177_v12, %v1907_v23  ;;  %vm205_vm3 = vcmp.le.f32.partialorder %v166_v25, 0.36  ;;  %v3664_v8 = vmov 0 }
  0x9c   :  { %v163_v15 = vmul.f32 %v159_v11, %v159_v11  ;;  %vm204_vm2 = vcmp.le.f32.partialorder %v165_v13, 0.36  ;;  %v3670_v11 = vmov 0  ;;  %v3672_v12 = vmov 0  ;;  %p2698_p4 = pnand %p2697_p3, %p2691_p0 }
  0x9d   :  { %v151_v21 = vpop.permute.xlu1 %150  ;;  %vm2966_vm6 = vmand %vm200_vm1, %vm204_vm2  ;;  %v3674_v13 = vmov 0  ;;  %v3684_v25 = vmov 0 }
  0x9e   :  { %v160_v29 = vsub.f32 %v151_v21, %v156_v51  ;;  %v192_v30 = vpop.permute.xlu0 %191  ;;  %v167_v32 = vadd.f32 %v163_v15, %v135_v18  ;;  %v3676_v15 = vmov 0  ;;  %v3678_v18 = vmov 0 }
  0x9f   :  { %vm203_vm4 = vcmp.eq.f32.partialorder %v192_v30, %v1907_v23  ;;  %v3680_v21 = vmov 0  ;;  %v3690_v30 = vmov 0 }
  0xa0   :  { %v164_v31 = vmul.f32 %v160_v29, %v160_v29  ;;  %vm206_vm10 = vcmp.le.f32.partialorder %v167_v32, 0.36  ;;  %v3688_v29 = vmov 0  ;;  %v2742_v32 = vmov 0.0  }
  0xa2   :  { %v182_v34 = vpop.permute.xlu1 %181  ;;  %v168_v35 = vadd.f32 %v164_v31, %v136_v26  ;;  %v3692_v31 = vmov 0  ;;  %v2689_v26 = vld [vmem:[%s3638_s8 + $0x38] sm:$0xff]  }
  0xa3   :  { %vm201_vm5 = vcmp.eq.f32.partialorder %v182_v34, %v1907_v23  ;;  %v3695_v34 = vmov 0 }
  0xa4   :  { %vm207_vm7 = vcmp.le.f32.partialorder %v168_v35, 0.36  ;;  %vm2970_vm8 = vmand %vm201_vm5, %vm205_vm3  ;;  %v3697_v35 = vmov 0 }
  0xa5   :  { %vm2974_vm9 = vmand %vm203_vm4, %vm207_vm7 }
  0xa6   :  { %v187_v39 = vpop.permute.xlu1 %186  ;;  %vm1925_vm11 = vmpackc.low %vm2970_vm8, %vm2966_vm6 }
  0xa7   :  { %vm202_vm12 = vcmp.eq.f32.partialorder %v187_v39, %v1907_v23  ;;  %2294 = vmatprep.mubr.msk.bf16.mxu1 %vm1925_vm11, %v2741_v40  ;;  %v3682_v23 = vmov 0 }
  0xa8   :  { %vm2983_vm13 = vmand %vm202_vm12, %vm206_vm10 }
  0xa9   :  { %vm1927_vm14 = vmpackc.low %vm2974_vm9, %vm2983_vm13 }
  0xaa   :  { %vm1690_vm15 = vmpackc.even %vm1927_vm14, %vm1925_vm11  ;;  %2295 = vmatmul.mubr.msk.bf16.vlgmr.msra.gmra.mrb[0].mxu1 %vm1927_vm14, %v2741_v40  ;;  %v220_v43 = vpop.permute.xlu1 %219 }
  0xab   :  { %2319 = vmatpush3.bf16.msra.mxu1 %v2855_v14  ;;  %v1691_v42 = vsel %vm1690_vm15, 16843009, %v2740_v17  ;;  %v225_v17 = vpop.permute.xlu0 %224  ;;  %v243_v50 = vadd.f32 %v1908_v44, %v220_v43 }
  0xac   :  { %2320 = vmatprep.subr.bf16.mxu1 %v2860_v16  ;;  %1692 = vst [vmem:[#allocation6] sm:$0xff] %v1691_v42  ;;  %v244_v46 = vadd.f32 %v1908_v44, %v225_v17 }
  0xae   :  { %v230_v51 = vpop.permute.xlu1 %229 }
  0xaf   :  { %2321 = vmatpush3.bf16.msra.mxu1 %v2860_v16  ;;  %v235_v49 = vpop.permute.xlu0 %234  ;;  %v245_v57 = vadd.f32 %v1908_v44, %v230_v51 }
  0xb0   :  { %2322 = vmatprep.subr.bf16.mxu1 %v2875_v19  ;;  %v246_v56 = vadd.f32 %v1908_v44, %v235_v49 }
  0xb3   :  { %2323 = vmatpush3.bf16.msra.mxu1 %v2875_v19 }
  0xb4   :  { %2324 = vmatprep.subr.bf16.mxu1 %v2886_v20 }
  0xb7   :  { %2325 = vmatpush3.bf16.msra.mxu1 %v2886_v20 }
  0xb8   :  { %2326 = vmatprep.subr.bf16.mxu1 %v2897_v22 }
  0xbb   :  { %2327 = vmatpush3.bf16.msra.mxu1 %v2897_v22 }
  0xbc   :  { %2328 = vmatprep.subr.bf16.mxu1 %v2909_v24 }
  0xbf   :  { %2329 = vmatpush3.bf16.msra.mxu1 %v2909_v24 }
  0xc0   :  { %2330 = vmatprep.subr.bf16.mxu1 %v2924_v27 }
  0xc3   :  { %2331 = vmatpush3.bf16.msra.mxu1 %v2924_v27 }
  0xc4   :  { %2332 = vmatprep.subr.bf16.mxu1 %v2933_v28 }
  0xc7   :  { %2333 = vmatpush3.bf16.msra.mxu1 %v2933_v28 }
  0xc8   :  { %2358 = vmatprep.subr.bf16.mxu1 %v2855_v14 }
  0xe0   :  { %v2274_v45 = vpop.f32.mrb[0].mxu0 }
  0xe1   :  { %v346_v47 = vmul.f32 2.0, %v2274_v45  ;;  %v326_v48 = vpop.f32.mrb[1].mxu0 }
  0xe2   :  { %v345_v52 = vmul.f32 2.0, %v326_v48 }
  0xe3   :  { %v350_v53 = vsub.f32 %v244_v46, %v346_v47 }
  0xe4   :  { %v349_v54 = vsub.f32 %v243_v50, %v345_v52  ;;  %v2277_v55 = vpop.f32.mrb[2].mxu0 }
  0xe5   :  { %v3014_v58 = vsel %vm2970_vm8, %v350_v53, inf  ;;  %v348_v59 = vmul.f32 2.0, %v2277_v55  ;;  %v336_v60 = vpop.f32.mrb[3].mxu0 }
  0xe6   :  { %v3018_v61 = vsel %vm2966_vm6, %v349_v54, inf  ;;  %v347_v62 = vmul.f32 2.0, %v336_v60  ;;  %vm496_vm1 = vcmp.le.f32.partialorder %v3014_v58, 0.0025  ;;  %vm566_vm2 = vcmp.le.f32.partialorder %v3014_v58, 0.007511111 }
  0xe7   :  { %v352_v63 = vsub.f32 %v246_v56, %v348_v59  ;;  %vm495_vm3 = vcmp.le.f32.partialorder %v3018_v61, 0.0025  ;;  %vm565_vm4 = vcmp.le.f32.partialorder %v3018_v61, 0.007511111  ;;  %vm639_vm5 = vcmp.le.f32.partialorder %v3018_v61, 0.015211111 }
  0xe8   :  { %v351_v0 = vsub.f32 %v245_v57, %v347_v62  ;;  %vm1933_vm7 = vmpackc.low %vm496_vm1, %vm495_vm3  ;;  %vm640_vm8 = vcmp.le.f32.partialorder %v3014_v58, 0.015211111  ;;  %vm713_vm10 = vcmp.le.f32.partialorder %v3018_v61, 0.0256  ;;  %vm714_vm6 = vcmp.le.f32.partialorder %v3014_v58, 0.0256 }
  0xe9   :  { %v3030_v1 = vsel %vm2974_vm9, %v352_v63, inf  ;;  %2314 = vmatprep.mubr.msk.bf16.mxu0 %vm1933_vm7, %v2741_v40  ;;  %vm1942_vm11 = vmpackc.low %vm566_vm2, %vm565_vm4  ;;  %vm788_vm0 = vcmp.le.f32.partialorder %v3014_v58, 0.038677778  ;;  %v2682_v54 = vld [vmem:[%s3638_s8] sm:$0xff]  }
  0xea   :  { %v3035_v2 = vsel %vm2983_vm13, %v351_v0, inf  ;;  %2334 = vmatprep.mubr.msk.bf16.mxu1 %vm1942_vm11, %v2741_v40  ;;  %vm498_vm12 = vcmp.le.f32.partialorder %v3030_v1, 0.0025  ;;  %vm568_vm14 = vcmp.le.f32.partialorder %v3030_v1, 0.007511111  ;;  %vm3040_vm15 = vmpackc.low %vm640_vm8, %vm639_vm5 }
  0xeb   :  { %vm497_vm9 = vcmp.le.f32.partialorder %v3035_v2, 0.0025  ;;  %vm567_vm1 = vcmp.le.f32.partialorder %v3035_v2, 0.007511111  ;;  %vm3046_vm3 = vmpackc.low %vm714_vm6, %vm713_vm10  ;;  %vm641_vm13 = vcmp.le.f32.partialorder %v3035_v2, 0.015211111 }
  0xec   :  { %vm1935_vm2 = vmpackc.low %vm498_vm12, %vm497_vm9  ;;  %vm642_vm4 = vcmp.le.f32.partialorder %v3030_v1, 0.015211111  ;;  %vm715_vm7 = vcmp.le.f32.partialorder %v3035_v2, 0.0256  ;;  %vm716_vm5 = vcmp.le.f32.partialorder %v3030_v1, 0.0256 }
  0xed   :  { %2315 = vmatmul.mubr.msk.bf16.vlgmr.msra.gmra.mrb[4].mxu0 %vm1935_vm2, %v2741_v40  ;;  %vm1944_vm8 = vmpackc.low %vm568_vm14, %vm567_vm1  ;;  %vm787_vm11 = vcmp.le.f32.partialorder %v3018_v61, 0.038677778  ;;  %vm861_vm6 = vcmp.le.f32.partialorder %v3018_v61, 0.054444443  ;;  %vm862_vm12 = vcmp.le.f32.partialorder %v3014_v58, 0.054444443 }
  0xee   :  { %2335 = vmatmul.mubr.msk.bf16.vlgmr.msra.gmra.mrb[4].mxu1 %vm1944_vm8, %v2741_v40  ;;  %2339 = vmatpush3.bf16.msra.mxu0 %v2855_v14  ;;  %vm3059_vm10 = vmpackc.low %vm642_vm4, %vm641_vm13  ;;  %vm789_vm9 = vcmp.le.f32.partialorder %v3035_v2, 0.038677778  ;;  %vm790_vm1 = vcmp.le.f32.partialorder %v3030_v1, 0.038677778  ;;  %vm864_vm2 = vcmp.le.f32.partialorder %v3030_v1, 0.054444443 }
  0xef   :  { %2359 = vmatpush3.bf16.msra.mxu1 %v2855_v14  ;;  %2354 = vmatprep.mubr.msk.bf16.mxu0 %vm3040_vm15, %v2741_v40  ;;  %vm3069_vm14 = vmpackc.low %vm716_vm5, %vm715_vm7  ;;  %vm863_vm15 = vcmp.le.f32.partialorder %v3035_v2, 0.054444443  ;;  %vm935_vm7 = vcmp.le.f32.partialorder %v3018_v61, 0.0729  ;;  %vm1009_vm5 = vcmp.le.f32.partialorder %v3018_v61, 0.09404445 }
  0xf0   :  { %2374 = vmatprep.mubr.msk.bf16.mxu1 %vm3046_vm3, %v2741_v40  ;;  %2340 = vmatprep.subr.bf16.mxu0 %v2860_v16  ;;  %vm3079_vm13 = vmpackc.low %vm788_vm0, %vm787_vm11  ;;  %vm936_vm3 = vcmp.le.f32.partialorder %v3014_v58, 0.0729  ;;  %vm1010_vm8 = vcmp.le.f32.partialorder %v3014_v58, 0.09404445 }
  0xf1   :  { %2360 = vmatprep.subr.bf16.mxu1 %v2860_v16  ;;  %vm3086_vm4 = vmpackc.low %vm862_vm12, %vm861_vm6  ;;  %vm937_vm6 = vcmp.le.f32.partialorder %v3035_v2, 0.0729  ;;  %vm938_vm12 = vcmp.le.f32.partialorder %v3030_v1, 0.0729 }
  0xf2   :  { %v3665_v8 = vsel %vm3086_vm4, 4294967295, %v3664_v8  ;;  %2341 = vmatpush3.bf16.msra.mxu0 %v2860_v16  ;;  %vm3093_vm0 = vmpackc.low %vm790_vm1, %vm789_vm9  ;;  %vm1011_vm1 = vcmp.le.f32.partialorder %v3035_v2, 0.09404445 }
  0xf3   :  { %v3667_v9 = vsel %vm3093_vm0, 4294967295, %v3666_v9  ;;  %2361 = vmatpush3.bf16.msra.mxu1 %v2860_v16  ;;  %2342 = vmatprep.subr.bf16.mxu0 %v2875_v19  ;;  %vm3101_vm11 = vmpackc.low %vm864_vm2, %vm863_vm15  ;;  %vm1012_vm0 = vcmp.le.f32.partialorder %v3030_v1, 0.09404445  ;;  %vm1083_vm15 = vcmp.le.f32.partialorder %v3018_v61, 0.11787778 }
  0xf4   :  { %v3669_v10 = vsel %vm3101_vm11, 4294967295, %v3668_v10  ;;  %2362 = vmatprep.subr.bf16.mxu1 %v2875_v19  ;;  %vm3108_vm9 = vmpackc.low %vm936_vm3, %vm935_vm7  ;;  %vm1084_vm2 = vcmp.le.f32.partialorder %v3014_v58, 0.11787778  ;;  %vm1157_vm7 = vcmp.le.f32.partialorder %v3018_v61, 0.1444 }
  0xf5   :  { %v3671_v11 = vsel %vm3108_vm9, 4294967295, %v3670_v11  ;;  %vm3114_vm4 = vmpackc.low %vm1010_vm8, %vm1009_vm5  ;;  %vm1158_vm3 = vcmp.le.f32.partialorder %v3014_v58, 0.1444  ;;  %vm1085_vm8 = vcmp.le.f32.partialorder %v3035_v2, 0.11787778 }
  0xf6   :  { %v3673_v12 = vsel %vm3114_vm4, 4294967295, %v3672_v12  ;;  %2343 = vmatpush3.bf16.msra.mxu0 %v2875_v19  ;;  %vm3121_vm11 = vmpackc.low %vm938_vm12, %vm937_vm6  ;;  %vm1086_vm4 = vcmp.le.f32.partialorder %v3030_v1, 0.11787778  ;;  %vm1159_vm12 = vcmp.le.f32.partialorder %v3035_v2, 0.1444 }
  0xf7   :  { %v3675_v13 = vsel %vm3121_vm11, 4294967295, %v3674_v13  ;;  %2363 = vmatpush3.bf16.msra.mxu1 %v2875_v19  ;;  %2344 = vmatprep.subr.bf16.mxu0 %v2886_v20  ;;  %vm3129_vm5 = vmpackc.low %vm1012_vm0, %vm1011_vm1  ;;  %vm1160_vm11 = vcmp.le.f32.partialorder %v3030_v1, 0.1444  ;;  %vm1231_vm0 = vcmp.le.f32.partialorder %v3018_v61, 0.1736111 }
  0xf8   :  { %v3677_v15 = vsel %vm3129_vm5, 4294967295, %v3676_v15  ;;  %2364 = vmatprep.subr.bf16.mxu1 %v2886_v20  ;;  %vm3136_vm6 = vmpackc.low %vm1084_vm2, %vm1083_vm15  ;;  %vm1232_vm1 = vcmp.le.f32.partialorder %v3014_v58, 0.1736111  ;;  %vm1305_vm15 = vcmp.le.f32.partialorder %v3018_v61, 0.20551111 }
  0xf9   :  { %v3679_v18 = vsel %vm3136_vm6, 4294967295, %v3678_v18  ;;  %vm3142_vm9 = vmpackc.low %vm1158_vm3, %vm1157_vm7  ;;  %vm1306_vm2 = vcmp.le.f32.partialorder %v3014_v58, 0.20551111  ;;  %vm1233_vm3 = vcmp.le.f32.partialorder %v3035_v2, 0.1736111 }
  0xfa   :  { %v3681_v21 = vsel %vm3142_vm9, 4294967295, %v3680_v21  ;;  %2345 = vmatpush3.bf16.msra.mxu0 %v2886_v20  ;;  %vm3149_vm5 = vmpackc.low %vm1086_vm4, %vm1085_vm8  ;;  %vm1234_vm9 = vcmp.le.f32.partialorder %v3030_v1, 0.1736111  ;;  %vm1307_vm8 = vcmp.le.f32.partialorder %v3035_v2, 0.20551111 }
  0xfb   :  { %v3683_v23 = vsel %vm3149_vm5, 4294967295, %v3682_v23  ;;  %2365 = vmatpush3.bf16.msra.mxu1 %v2886_v20  ;;  %2346 = vmatprep.subr.bf16.mxu0 %v2897_v22  ;;  %vm3157_vm7 = vmpackc.low %vm1160_vm11, %vm1159_vm12  ;;  %vm1308_vm5 = vcmp.le.f32.partialorder %v3030_v1, 0.20551111  ;;  %vm1379_vm11 = vcmp.le.f32.partialorder %v3018_v61, 0.2401 }
  0xfc   :  { %v3685_v25 = vsel %vm3157_vm7, 4294967295, %v3684_v25  ;;  %2366 = vmatprep.subr.bf16.mxu1 %v2897_v22  ;;  %vm3164_vm4 = vmpackc.low %vm1232_vm1, %vm1231_vm0  ;;  %vm1453_vm0 = vcmp.le.f32.partialorder %v3018_v61, 0.27737778  ;;  %vm1454_vm1 = vcmp.le.f32.partialorder %v3014_v58, 0.27737778 }
  0xfd   :  { %vm3170_vm6 = vmpackc.low %vm1306_vm2, %vm1305_vm15  ;;  %vm3645_vm15 = vcmask 7168   ;;  %vm1456_vm12 = vcmp.le.f32.partialorder %v3030_v1, 0.27737778 }
  0xfe   :  { %v3689_v29 = vsel %vm3170_vm6, 4294967295, %v3688_v29  ;;  %2347 = vmatpush3.bf16.msra.mxu0 %v2897_v22  ;;  %vm3177_vm7 = vmpackc.low %vm1234_vm9, %vm1233_vm3  ;;  %vm1382_vm9 = vcmp.le.f32.partialorder %v3030_v1, 0.2401  ;;  %58 = vst.msk [vmem:[#allocation3 + $0x10] sm:$0xff] %vm3645_vm15, %v2742_v32  ;;  %vm1602_vm6 = vcmp.le.f32.partialorder %v3014_v58, 0.36 }
  0xff   :  { %v3691_v30 = vsel %vm3177_vm7, 4294967295, %v3690_v30  ;;  %2367 = vmatpush3.bf16.msra.mxu1 %v2897_v22  ;;  %2348 = vmatprep.subr.bf16.mxu0 %v2909_v24  ;;  %vm3185_vm2 = vmpackc.low %vm1308_vm5, %vm1307_vm8  ;;  %56 = vst.msk [vmem:[#allocation3] sm:$0xff] %vm3645_vm15, %v2742_v32  ;;  %vm3694_vm5 = vcmp.le.f32.partialorder %v3014_v58, 0.2401  ;;  %vm1455_vm8 = vcmp.le.f32.partialorder %v3035_v2, 0.27737778 }
 0x100   :  { %v3693_v31 = vsel %vm3185_vm2, 4294967295, %v3692_v31  ;;  %2368 = vmatprep.subr.bf16.mxu1 %v2909_v24  ;;  %57 = vst.msk [vmem:[#allocation3 + $0x8] sm:$0xff] %vm3645_vm15, %v2742_v32  ;;  %59 = vst.msk [vmem:[#allocation3 + $0x18] sm:$0xff] %vm3645_vm15, %v2742_v32  ;;  %vm1527_vm15 = vcmp.le.f32.partialorder %v3018_v61, 0.31734446 }
 0x101   :  { %vm3204_vm3 = vmpackc.low %vm3694_vm5, %vm1379_vm11  ;;  %vm1528_vm7 = vcmp.le.f32.partialorder %v3014_v58, 0.31734446  ;;  %vm3699_vm11 = vcmp.le.f32.partialorder %v3035_v2, 0.2401 }
 0x102   :  { %v3696_v34 = vsel %vm3204_vm3, 4294967295, %v3695_v34  ;;  %vm3214_vm2 = vmpackc.low %vm1454_vm1, %vm1453_vm0  ;;  %2349 = vmatpush3.bf16.msra.mxu0 %v2909_v24  ;;  %vm1601_vm3 = vcmp.le.f32.partialorder %v3018_v61, 0.36  ;;  %vm1529_vm1 = vcmp.le.f32.partialorder %v3035_v2, 0.31734446  ;;  %v2683_v61 = vld [vmem:[%s3638_s8 + $0x8] sm:$0xff]  }
 0x103   :  { %v3698_v35 = vsel %vm3214_vm2, 4294967295, %v3697_v35  ;;  %vm3223_vm5 = vmpackc.low %vm1382_vm9, %vm3699_vm11  ;;  %2369 = vmatpush3.bf16.msra.mxu1 %v2909_v24  ;;  %2350 = vmatprep.subr.bf16.mxu0 %v2924_v27  ;;  %vm1530_vm2 = vcmp.le.f32.partialorder %v3030_v1, 0.31734446 }
 0x104   :  { %v3701_v36 = vsel %vm3223_vm5, 4294967295, %v3700_v36  ;;  %vm3231_vm0 = vmpackc.low %vm1456_vm12, %vm1455_vm8  ;;  %2370 = vmatprep.subr.bf16.mxu1 %v2924_v27  ;;  %vm1603_vm5 = vcmp.le.f32.partialorder %v3035_v2, 0.36  ;;  %vm1604_vm12 = vcmp.le.f32.partialorder %v3030_v1, 0.36 }
 0x105   :  { %vm3238_vm9 = vmpackc.low %vm1528_vm7, %vm1527_vm15  ;;  %vm3712_vm7 = vnez %v3665_v8  ;;  %vm3716_vm15 = vnez %v3673_v12 }
 0x106   :  { %vm3242_vm11 = vmpackc.low %vm1602_vm6, %vm1601_vm3  ;;  %2351 = vmatpush3.bf16.msra.mxu0 %v2924_v27  ;;  %vm3718_vm3 = vnez %v3677_v15 }
 0x107   :  { %vm3249_vm8 = vmpackc.low %vm1530_vm2, %vm1529_vm1  ;;  %2371 = vmatpush3.bf16.msra.mxu1 %v2924_v27  ;;  %2352 = vmatprep.subr.bf16.mxu0 %v2933_v28  ;;  %vm3717_vm2 = vnez %v3675_v13  ;;  %vm3720_vm1 = vnez %v3681_v21  ;;  %v485_v43 = vld [vmem:[#allocation3 + $0x18] sm:$0xff]  ;;  %v483_v46 = vld [vmem:[#allocation3 + $0x8] sm:$0xff] }
 0x108   :  { %2372 = vmatprep.subr.bf16.mxu1 %v2933_v28  ;;  %vm3256_vm6 = vmpackc.low %vm1604_vm12, %vm1603_vm5  ;;  %vm3719_vm5 = vnez %v3679_v18  ;;  %vm3721_vm12 = vnez %v3683_v23 }
 0x10a   :  { %2353 = vmatpush3.bf16.msra.mxu0 %v2933_v28 }
 0x10b   :  { %2373 = vmatpush3.bf16.msra.mxu1 %v2933_v28  ;;  %2378 = vmatprep.subr.bf16.mxu0 %v2855_v14 }
 0x10c   :  { %2398 = vmatprep.subr.bf16.mxu1 %v2855_v14 }
 0x10d   :  { %2355 = vmatmul.mubr.msk.bf16.vlgmr.msra.gmra.mrb[8].mxu0 %vm3059_vm10, %v2741_v40  ;;  %vm3713_vm10 = vnez %v3667_v9 }
 0x10e   :  { %2375 = vmatmul.mubr.msk.bf16.vlgmr.msra.gmra.mrb[8].mxu1 %vm3069_vm14, %v2741_v40  ;;  %2379 = vmatpush3.bf16.msra.mxu0 %v2855_v14  ;;  %vm3714_vm14 = vnez %v3669_v10  ;;  %v2688_v10 = vld [vmem:[%s3638_s8 + $0x30] sm:$0xff]  }
 0x10f   :  { %2394 = vmatprep.mubr.msk.bf16.mxu0 %vm3079_vm13, %v2741_v40  ;;  %2399 = vmatpush3.bf16.msra.mxu1 %v2855_v14  ;;  %vm3715_vm13 = vnez %v3671_v11 }
 0x110   :  { %2414 = vmatprep.mubr.msk.bf16.mxu1 %vm3712_vm7, %v2741_v40  ;;  %2380 = vmatprep.subr.bf16.mxu0 %v2860_v16  ;;  %vm3722_vm7 = vnez %v3685_v25 }
 0x111   :  { %2400 = vmatprep.subr.bf16.mxu1 %v2860_v16 }
 0x112   :  { %2381 = vmatpush3.bf16.msra.mxu0 %v2860_v16 }
 0x113   :  { %2401 = vmatpush3.bf16.msra.mxu1 %v2860_v16  ;;  %2382 = vmatprep.subr.bf16.mxu0 %v2875_v19 }
 0x114   :  { %2402 = vmatprep.subr.bf16.mxu1 %v2875_v19 }
 0x116   :  { %2383 = vmatpush3.bf16.msra.mxu0 %v2875_v19 }
 0x117   :  { %2403 = vmatpush3.bf16.msra.mxu1 %v2875_v19  ;;  %2384 = vmatprep.subr.bf16.mxu0 %v2886_v20 }
 0x118   :  { %2404 = vmatprep.subr.bf16.mxu1 %v2886_v20 }
 0x11a   :  { %2385 = vmatpush3.bf16.msra.mxu0 %v2886_v20 }
 0x11b   :  { %2405 = vmatpush3.bf16.msra.mxu1 %v2886_v20  ;;  %2386 = vmatprep.subr.bf16.mxu0 %v2897_v22 }
 0x11c   :  { %2406 = vmatprep.subr.bf16.mxu1 %v2897_v22 }
 0x11e   :  { %2387 = vmatpush3.bf16.msra.mxu0 %v2897_v22 }
 0x11f   :  { %2407 = vmatpush3.bf16.msra.mxu1 %v2897_v22  ;;  %2388 = vmatprep.subr.bf16.mxu0 %v2909_v24 }
 0x120   :  { %2408 = vmatprep.subr.bf16.mxu1 %v2909_v24 }
 0x122   :  { %2389 = vmatpush3.bf16.msra.mxu0 %v2909_v24 }
 0x123   :  { %2409 = vmatpush3.bf16.msra.mxu1 %v2909_v24  ;;  %2390 = vmatprep.subr.bf16.mxu0 %v2924_v27 }
 0x124   :  { %2410 = vmatprep.subr.bf16.mxu1 %v2924_v27 }
 0x126   :  { %2391 = vmatpush3.bf16.msra.mxu0 %v2924_v27 }
 0x127   :  { %2411 = vmatpush3.bf16.msra.mxu1 %v2924_v27  ;;  %2392 = vmatprep.subr.bf16.mxu0 %v2933_v28 }
 0x128   :  { %2412 = vmatprep.subr.bf16.mxu1 %v2933_v28 }
 0x12a   :  { %2393 = vmatpush3.bf16.msra.mxu0 %v2933_v28 }
 0x12b   :  { %2413 = vmatpush3.bf16.msra.mxu1 %v2933_v28  ;;  %2418 = vmatprep.subr.bf16.mxu0 %v2855_v14 }
 0x12c   :  { %2438 = vmatprep.subr.bf16.mxu1 %v2855_v14 }
 0x12d   :  { %2395 = vmatmul.mubr.msk.bf16.vlgmr.msra.gmra.mrb[12].mxu0 %vm3713_vm10, %v2741_v40  ;;  %vm3723_vm10 = vnez %v3689_v29 }
 0x12e   :  { %2415 = vmatmul.mubr.msk.bf16.vlgmr.msra.gmra.mrb[12].mxu1 %vm3714_vm14, %v2741_v40  ;;  %2419 = vmatpush3.bf16.msra.mxu0 %v2855_v14 }
 0x12f   :  { %2434 = vmatprep.mubr.msk.bf16.mxu0 %vm3715_vm13, %v2741_v40  ;;  %2439 = vmatpush3.bf16.msra.mxu1 %v2855_v14 }
 0x130   :  { %2454 = vmatprep.mubr.msk.bf16.mxu1 %vm3716_vm15, %v2741_v40  ;;  %2420 = vmatprep.subr.bf16.mxu0 %v2860_v16 }
 0x131   :  { %2440 = vmatprep.subr.bf16.mxu1 %v2860_v16 }
 0x132   :  { %2421 = vmatpush3.bf16.msra.mxu0 %v2860_v16 }
 0x133   :  { %2441 = vmatpush3.bf16.msra.mxu1 %v2860_v16  ;;  %2422 = vmatprep.subr.bf16.mxu0 %v2875_v19 }
 0x134   :  { %2442 = vmatprep.subr.bf16.mxu1 %v2875_v19 }
 0x136   :  { %2423 = vmatpush3.bf16.msra.mxu0 %v2875_v19 }
 0x137   :  { %2443 = vmatpush3.bf16.msra.mxu1 %v2875_v19  ;;  %2424 = vmatprep.subr.bf16.mxu0 %v2886_v20 }
 0x138   :  { %2444 = vmatprep.subr.bf16.mxu1 %v2886_v20 }
 0x13a   :  { %2425 = vmatpush3.bf16.msra.mxu0 %v2886_v20 }
 0x13b   :  { %2445 = vmatpush3.bf16.msra.mxu1 %v2886_v20  ;;  %2426 = vmatprep.subr.bf16.mxu0 %v2897_v22 }
 0x13c   :  { %2446 = vmatprep.subr.bf16.mxu1 %v2897_v22 }
 0x13e   :  { %2427 = vmatpush3.bf16.msra.mxu0 %v2897_v22 }
 0x13f   :  { %2447 = vmatpush3.bf16.msra.mxu1 %v2897_v22  ;;  %2428 = vmatprep.subr.bf16.mxu0 %v2909_v24 }
 0x140   :  { %2448 = vmatprep.subr.bf16.mxu1 %v2909_v24 }
 0x142   :  { %2429 = vmatpush3.bf16.msra.mxu0 %v2909_v24 }
 0x143   :  { %2449 = vmatpush3.bf16.msra.mxu1 %v2909_v24  ;;  %2430 = vmatprep.subr.bf16.mxu0 %v2924_v27 }
 0x144   :  { %2450 = vmatprep.subr.bf16.mxu1 %v2924_v27 }
 0x146   :  { %2431 = vmatpush3.bf16.msra.mxu0 %v2924_v27 }
 0x147   :  { %2451 = vmatpush3.bf16.msra.mxu1 %v2924_v27  ;;  %2432 = vmatprep.subr.bf16.mxu0 %v2933_v28 }
 0x148   :  { %2452 = vmatprep.subr.bf16.mxu1 %v2933_v28 }
 0x14a   :  { %2433 = vmatpush3.bf16.msra.mxu0 %v2933_v28 }
 0x14b   :  { %2453 = vmatpush3.bf16.msra.mxu1 %v2933_v28  ;;  %2458 = vmatprep.subr.bf16.mxu0 %v2855_v14 }
 0x14c   :  { %2478 = vmatprep.subr.bf16.mxu1 %v2855_v14 }
 0x14d   :  { %2435 = vmatmul.mubr.msk.bf16.vlgmr.msra.gmra.mrb[16].mxu0 %vm3717_vm2, %v2741_v40  ;;  %vm3728_vm2 = vnez %v3691_v30 }
 0x14e   :  { %2455 = vmatmul.mubr.msk.bf16.vlgmr.msra.gmra.mrb[16].mxu1 %vm3718_vm3, %v2741_v40  ;;  %2459 = vmatpush3.bf16.msra.mxu0 %v2855_v14  ;;  %vm3729_vm3 = vnez %v3693_v31 }
 0x14f   :  { %2474 = vmatprep.mubr.msk.bf16.mxu0 %vm3719_vm5, %v2741_v40  ;;  %2479 = vmatpush3.bf16.msra.mxu1 %v2855_v14  ;;  %vm3730_vm5 = vnez %v3696_v34 }
 0x150   :  { %2494 = vmatprep.mubr.msk.bf16.mxu1 %vm3720_vm1, %v2741_v40  ;;  %2460 = vmatprep.subr.bf16.mxu0 %v2860_v16  ;;  %vm3731_vm1 = vnez %v3698_v35 }
 0x151   :  { %2480 = vmatprep.subr.bf16.mxu1 %v2860_v16 }
 0x152   :  { %2461 = vmatpush3.bf16.msra.mxu0 %v2860_v16 }
 0x153   :  { %2481 = vmatpush3.bf16.msra.mxu1 %v2860_v16  ;;  %2462 = vmatprep.subr.bf16.mxu0 %v2875_v19 }
 0x154   :  { %2482 = vmatprep.subr.bf16.mxu1 %v2875_v19 }
 0x156   :  { %2463 = vmatpush3.bf16.msra.mxu0 %v2875_v19 }
 0x157   :  { %2483 = vmatpush3.bf16.msra.mxu1 %v2875_v19  ;;  %2464 = vmatprep.subr.bf16.mxu0 %v2886_v20 }
 0x158   :  { %2484 = vmatprep.subr.bf16.mxu1 %v2886_v20 }
 0x15a   :  { %2465 = vmatpush3.bf16.msra.mxu0 %v2886_v20 }
 0x15b   :  { %2485 = vmatpush3.bf16.msra.mxu1 %v2886_v20  ;;  %2466 = vmatprep.subr.bf16.mxu0 %v2897_v22 }
 0x15c   :  { %2486 = vmatprep.subr.bf16.mxu1 %v2897_v22 }
 0x15e   :  { %2467 = vmatpush3.bf16.msra.mxu0 %v2897_v22 }
 0x15f   :  { %2487 = vmatpush3.bf16.msra.mxu1 %v2897_v22  ;;  %2468 = vmatprep.subr.bf16.mxu0 %v2909_v24 }
 0x160   :  { %2488 = vmatprep.subr.bf16.mxu1 %v2909_v24 }
 0x162   :  { %2469 = vmatpush3.bf16.msra.mxu0 %v2909_v24 }
 0x163   :  { %2489 = vmatpush3.bf16.msra.mxu1 %v2909_v24  ;;  %2470 = vmatprep.subr.bf16.mxu0 %v2924_v27 }
 0x164   :  { %2490 = vmatprep.subr.bf16.mxu1 %v2924_v27 }
 0x166   :  { %2471 = vmatpush3.bf16.msra.mxu0 %v2924_v27 }
 0x167   :  { %2491 = vmatpush3.bf16.msra.mxu1 %v2924_v27  ;;  %2472 = vmatprep.subr.bf16.mxu0 %v2933_v28 }
 0x168   :  { %2492 = vmatprep.subr.bf16.mxu1 %v2933_v28 }
 0x16a   :  { %2473 = vmatpush3.bf16.msra.mxu0 %v2933_v28 }
 0x16b   :  { %2493 = vmatpush3.bf16.msra.mxu1 %v2933_v28  ;;  %2498 = vmatprep.subr.bf16.mxu0 %v2855_v14 }
 0x16c   :  { %2518 = vmatprep.subr.bf16.mxu1 %v2855_v14 }
 0x16d   :  { %2475 = vmatmul.mubr.msk.bf16.vlgmr.msra.gmra.mrb[20].mxu0 %vm3721_vm12, %v2741_v40  ;;  %vm3732_vm12 = vnez %v3701_v36 }
 0x16e   :  { %2495 = vmatmul.mubr.msk.bf16.vlgmr.msra.gmra.mrb[20].mxu1 %vm3722_vm7, %v2741_v40  ;;  %2499 = vmatpush3.bf16.msra.mxu0 %v2855_v14 }
 0x16f   :  { %2514 = vmatprep.mubr.msk.bf16.mxu0 %vm3164_vm4, %v2741_v40  ;;  %2519 = vmatpush3.bf16.msra.mxu1 %v2855_v14  ;;  %v484_v14 = vld [vmem:[#allocation3 + $0x10] sm:$0xff]  ;;  %vm3724_vm4 = vcmask 7168  }
 0x170   :  { %2534 = vmatprep.mubr.msk.bf16.mxu1 %vm3723_vm10, %v2741_v40  ;;  %2500 = vmatprep.subr.bf16.mxu0 %v2860_v16  ;;  %vm3725_vm14 = vmmov %vm3724_vm4 }
 0x171   :  { %2520 = vmatprep.subr.bf16.mxu1 %v2860_v16  ;;  %vm3726_vm13 = vmmov %vm3724_vm4 }
 0x172   :  { %2501 = vmatpush3.bf16.msra.mxu0 %v2860_v16  ;;  %vm3727_vm15 = vmmov %vm3724_vm4 }
 0x173   :  { %2521 = vmatpush3.bf16.msra.mxu1 %v2860_v16  ;;  %2502 = vmatprep.subr.bf16.mxu0 %v2875_v19  ;;  %v482_v16 = vld [vmem:[#allocation3] sm:$0xff] }
 0x174   :  { %2522 = vmatprep.subr.bf16.mxu1 %v2875_v19 }
 0x176   :  { %2503 = vmatpush3.bf16.msra.mxu0 %v2875_v19 }
 0x177   :  { %2523 = vmatpush3.bf16.msra.mxu1 %v2875_v19  ;;  %2504 = vmatprep.subr.bf16.mxu0 %v2886_v20 }
 0x178   :  { %2524 = vmatprep.subr.bf16.mxu1 %v2886_v20 }
 0x17a   :  { %2505 = vmatpush3.bf16.msra.mxu0 %v2886_v20 }
 0x17b   :  { %2525 = vmatpush3.bf16.msra.mxu1 %v2886_v20  ;;  %2506 = vmatprep.subr.bf16.mxu0 %v2897_v22 }
 0x17c   :  { %2526 = vmatprep.subr.bf16.mxu1 %v2897_v22 }
 0x17d   :  { %v2296_v17 = vpop.f32.mrb[0].mxu1 }
 0x17e   :  { %2507 = vmatpush3.bf16.msra.mxu0 %v2897_v22  ;;  %v488_v44 = vadd.f32 %v2296_v17, %v484_v14  ;;  %v467_v45 = vpop.f32.mrb[1].mxu1 }
 0x17f   :  { %2527 = vmatpush3.bf16.msra.mxu1 %v2897_v22  ;;  %2508 = vmatprep.subr.bf16.mxu0 %v2909_v24  ;;  %v486_v47 = vadd.f32 %v482_v16, %v467_v45  ;;  %v2297_v48 = vpop.f32.mrb[2].mxu1 }
 0x180   :  { %2528 = vmatprep.subr.bf16.mxu1 %v2909_v24  ;;  %493 = vst.msk [vmem:[#allocation3 + $0x10] sm:$0xff] %vm3724_vm4, %v488_v44  ;;  %v489_v49 = vadd.f32 %v2297_v48, %v485_v43  ;;  %v470_v50 = vpop.f32.mrb[3].mxu1 }
 0x181   :  { %491 = vst.msk [vmem:[#allocation3] sm:$0xff] %vm3725_vm14, %v486_v47  ;;  %v487_v51 = vadd.f32 %v483_v46, %v470_v50  ;;  %vm50_vm14 = vcmask 130048  }
 0x182   :  { %2509 = vmatpush3.bf16.msra.mxu0 %v2909_v24  ;;  %494 = vst.msk [vmem:[#allocation3 + $0x18] sm:$0xff] %vm3726_vm13, %v489_v49 }
 0x183   :  { %2529 = vmatpush3.bf16.msra.mxu1 %v2909_v24  ;;  %2510 = vmatprep.subr.bf16.mxu0 %v2924_v27  ;;  %492 = vst.msk [vmem:[#allocation3 + $0x8] sm:$0xff] %vm3727_vm15, %v487_v51 }
 0x184   :  { %2530 = vmatprep.subr.bf16.mxu1 %v2924_v27  ;;  %53 = vst.msk [vmem:[#allocation2 + $0x10] sm:$0xff] %vm50_vm14, %v2742_v32  ;;  %51 = vst.msk [vmem:[#allocation2] sm:$0xff] %vm50_vm14, %v2742_v32 }
 0x185   :  { %52 = vst.msk [vmem:[#allocation2 + $0x8] sm:$0xff] %vm50_vm14, %v2742_v32  ;;  %54 = vst.msk [vmem:[#allocation2 + $0x18] sm:$0xff] %vm50_vm14, %v2742_v32 }
 0x186   :  { %2511 = vmatpush3.bf16.msra.mxu0 %v2924_v27 }
 0x187   :  { %2531 = vmatpush3.bf16.msra.mxu1 %v2924_v27  ;;  %2512 = vmatprep.subr.bf16.mxu0 %v2933_v28  ;;  %v1698_v56 = vld [vmem:[#allocation3 + $0x10] sm:$0xff] }
 0x188   :  { %2532 = vmatprep.subr.bf16.mxu1 %v2933_v28  ;;  %v1696_v52 = vld [vmem:[#allocation3] sm:$0xff]  ;;  %v1702_v59 = vmax.f32 %v1698_v56, 1.0 }
 0x189   :  { %v1700_v53 = vmax.f32 %v1696_v52, 1.0  ;;  %v1699_v58 = vld [vmem:[#allocation3 + $0x18] sm:$0xff] }
 0x18a   :  { %2513 = vmatpush3.bf16.msra.mxu0 %v2933_v28  ;;  %v1697_v55 = vld [vmem:[#allocation3 + $0x8] sm:$0xff]  ;;  %v1703_v60 = vmax.f32 %v1699_v58, 1.0 }
 0x18b   :  { %2533 = vmatpush3.bf16.msra.mxu1 %v2933_v28  ;;  %2538 = vmatprep.subr.bf16.mxu0 %v2682_v54  ;;  %v1701_v57 = vmax.f32 %v1697_v55, 1.0 }
 0x18c   :  { %2558 = vmatprep.subr.bf16.mxu1 %v2682_v54  ;;  %1710 = vperm.xlu1 %2665, %v1700_v53  }
 0x18d   :  { %2515 = vmatmul.mubr.msk.bf16.vlgmr.msra.gmra.mrb[24].mxu0 %vm3728_vm2, %v2741_v40  ;;  %1715 = vperm.xlu0 %2664, %v1701_v57  }
 0x18e   :  { %2535 = vmatmul.mubr.msk.bf16.vlgmr.msra.gmra.mrb[24].mxu1 %vm3729_vm3, %v2741_v40  ;;  %2539 = vmatpush3.bf16.msra.mxu0 %v2682_v54 }
 0x18f   :  { %2554 = vmatprep.mubr.msk.bf16.mxu0 %vm3730_vm5, %v2741_v40  ;;  %2559 = vmatpush3.bf16.msra.mxu1 %v2682_v54 }
 0x190   :  { %2574 = vmatprep.mubr.msk.bf16.mxu1 %vm3731_vm1, %v2741_v40  ;;  %2540 = vmatprep.subr.bf16.mxu0 %v2683_v61 }
 0x191   :  { %2560 = vmatprep.subr.bf16.mxu1 %v2683_v61  ;;  %1720 = vperm.xlu1 %2665, %v1702_v59  }
 0x192   :  { %2541 = vmatpush3.bf16.msra.mxu0 %v2683_v61  ;;  %1725 = vperm.xlu0 %2664, %v1703_v60  }
 0x193   :  { %2561 = vmatpush3.bf16.msra.mxu1 %v2683_v61  ;;  %2542 = vmatprep.subr.bf16.mxu0 %v2875_v19 }
 0x194   :  { %2562 = vmatprep.subr.bf16.mxu1 %v2875_v19 }
 0x196   :  { %2543 = vmatpush3.bf16.msra.mxu0 %v2875_v19 }
 0x197   :  { %2563 = vmatpush3.bf16.msra.mxu1 %v2875_v19  ;;  %2544 = vmatprep.subr.bf16.mxu0 %v2886_v20  ;;  %v2684_v19 = vld [vmem:[%s3638_s8 + $0x10] sm:$0xff]  }
 0x198   :  { %2564 = vmatprep.subr.bf16.mxu1 %v2886_v20 }
 0x19a   :  { %2545 = vmatpush3.bf16.msra.mxu0 %v2886_v20 }
 0x19b   :  { %2565 = vmatpush3.bf16.msra.mxu1 %v2886_v20  ;;  %2546 = vmatprep.subr.bf16.mxu0 %v2897_v22  ;;  %v3500_v20 = vand.u32 127, %v93_v33  ;;  %v2687_v33 = vld [vmem:[%s3638_s8 + $0x28] sm:$0xff]  }
 0x19c   :  { %2566 = vmatprep.subr.bf16.mxu1 %v2897_v22 }
 0x19d   :  { %vm776_vm7 = vcmp.eq.s32.totalorder %v3500_v20, 3  ;;  %vm998_vm10 = vcmp.eq.s32.totalorder %v3500_v20, 6  ;;  %vm1072_vm4 = vcmp.eq.s32.totalorder %v3500_v20, 7  ;;  %vm1146_vm13 = vcmp.eq.s32.totalorder %v3500_v20, 8 }
 0x19e   :  { %2547 = vmatpush3.bf16.msra.mxu0 %v2897_v22  ;;  %v1964_v30 = vsel %vm776_vm7, 1.0, %v2742_v32  ;;  %vm1220_vm15 = vcmp.eq.s32.totalorder %v3500_v20, 9  ;;  %vm1294_vm2 = vcmp.eq.s32.totalorder %v3500_v20, 10  ;;  %vm1368_vm3 = vcmp.eq.s32.totalorder %v3500_v20, 11 }
 0x19f   :  { %2567 = vmatpush3.bf16.msra.mxu1 %v2897_v22  ;;  %2548 = vmatprep.subr.bf16.mxu0 %v2909_v24  ;;  %v2685_v22 = vld [vmem:[%s3638_s8 + $0x18] sm:$0xff]   ;;  %vm1442_vm5 = vcmp.eq.s32.totalorder %v3500_v20, 12  ;;  %vm1516_vm1 = vcmp.eq.s32.totalorder %v3500_v20, 13 }
 0x1a0   :  { %2568 = vmatprep.subr.bf16.mxu1 %v2909_v24 }
 0x1a2   :  { %2549 = vmatpush3.bf16.msra.mxu0 %v2909_v24 }
 0x1a3   :  { %2569 = vmatpush3.bf16.msra.mxu1 %v2909_v24  ;;  %2550 = vmatprep.subr.bf16.mxu0 %v2924_v27  ;;  %v2686_v24 = vld [vmem:[%s3638_s8 + $0x20] sm:$0xff]  }
 0x1a4   :  { %2570 = vmatprep.subr.bf16.mxu1 %v2924_v27 }
 0x1a6   :  { %2551 = vmatpush3.bf16.msra.mxu0 %v2924_v27 }
 0x1a7   :  { %2571 = vmatpush3.bf16.msra.mxu1 %v2924_v27  ;;  %2552 = vmatprep.subr.bf16.mxu0 %v2933_v28 }
 0x1a8   :  { %2572 = vmatprep.subr.bf16.mxu1 %v2933_v28 }
 0x1aa   :  { %2553 = vmatpush3.bf16.msra.mxu0 %v2933_v28 }
 0x1ab   :  { %2573 = vmatpush3.bf16.msra.mxu1 %v2933_v28  ;;  %2578 = vmatprep.subr.bf16.mxu0 %v2682_v54 }
 0x1ac   :  { %2598 = vmatprep.subr.bf16.mxu1 %v2682_v54 }
 0x1ad   :  { %2555 = vmatmul.mubr.msk.bf16.vlgmr.msra.gmra.mrb[28].mxu0 %vm3732_vm12, %v2741_v40  ;;  %vm1590_vm12 = vcmp.eq.s32.totalorder %v3500_v20, 14 }
 0x1ae   :  { %2575 = vmatmul.mubr.msk.bf16.vlgmr.msra.gmra.mrb[28].mxu1 %vm3231_vm0, %v2741_v40  ;;  %2579 = vmatpush3.bf16.msra.mxu0 %v2682_v54  ;;  %vm558_vm0 = vcmp.eq.s32.totalorder %v3500_v20, 0 }
 0x1af   :  { %2594 = vmatprep.mubr.msk.bf16.mxu0 %vm3238_vm9, %v2741_v40  ;;  %2599 = vmatpush3.bf16.msra.mxu1 %v2682_v54  ;;  %vm628_vm9 = vcmp.eq.s32.totalorder %v3500_v20, 1  ;;  %v1937_v27 = vsel %vm558_vm0, 1.0, %v2742_v32  ;;  %vm1664_vm0 = vcmp.eq.s32.totalorder %v3500_v20, 15 }
 0x1b0   :  { %2614 = vmatprep.mubr.msk.bf16.mxu1 %vm3242_vm11, %v2741_v40  ;;  %2580 = vmatprep.subr.bf16.mxu0 %v2683_v61  ;;  %v1946_v28 = vsel %vm628_vm9, 1.0, %v2742_v32  ;;  %vm702_vm11 = vcmp.eq.s32.totalorder %v3500_v20, 2  ;;  %vm3733_vm9 = vcmask 261120  }
 0x1b1   :  { %2600 = vmatprep.subr.bf16.mxu1 %v2683_v61  ;;  %v1955_v29 = vsel %vm702_vm11, 1.0, %v2742_v32  ;;  %vm3734_vm11 = vmmov %vm3733_vm9 }
 0x1b2   :  { %2581 = vmatpush3.bf16.msra.mxu0 %v2683_v61  ;;  %vm3735_vm7 = vmmov %vm3733_vm9 }
 0x1b3   :  { %2601 = vmatpush3.bf16.msra.mxu1 %v2683_v61  ;;  %2582 = vmatprep.subr.bf16.mxu0 %v2684_v19 }
 0x1b4   :  { %2602 = vmatprep.subr.bf16.mxu1 %v2684_v19 }
 0x1b6   :  { %2583 = vmatpush3.bf16.msra.mxu0 %v2684_v19 }
 0x1b7   :  { %2603 = vmatpush3.bf16.msra.mxu1 %v2684_v19  ;;  %2584 = vmatprep.subr.bf16.mxu0 %v2685_v22 }
 0x1b8   :  { %2604 = vmatprep.subr.bf16.mxu1 %v2685_v22 }
 0x1ba   :  { %2585 = vmatpush3.bf16.msra.mxu0 %v2685_v22 }
 0x1bb   :  { %2605 = vmatpush3.bf16.msra.mxu1 %v2685_v22  ;;  %2586 = vmatprep.subr.bf16.mxu0 %v2686_v24 }
 0x1bc   :  { %2606 = vmatprep.subr.bf16.mxu1 %v2686_v24 }
 0x1be   :  { %2587 = vmatpush3.bf16.msra.mxu0 %v2686_v24 }
 0x1bf   :  { %2607 = vmatpush3.bf16.msra.mxu1 %v2686_v24  ;;  %2588 = vmatprep.subr.bf16.mxu0 %v2687_v33 }
 0x1c0   :  { %v2316_v62 = vpop.f32.mrb[4].mxu0  ;;  %2608 = vmatprep.subr.bf16.mxu1 %v2687_v33 }
 0x1c1   :  { %v563_v63 = vmul.f32 %v2316_v62, %v1937_v27  ;;  %v2336_v0 = vpop.f32.mrb[4].mxu1  ;;  %v543_v1 = vpop.f32.mrb[5].mxu0 }
 0x1c2   :  { %v633_v2 = vmul.f32 %v2336_v0, %v1946_v28  ;;  %v561_v3 = vmul.f32 %v1937_v27, %v543_v1  ;;  %v613_v4 = vpop.f32.mrb[5].mxu1  ;;  %2589 = vmatpush3.bf16.msra.mxu0 %v2687_v33  ;;  %v2317_v5 = vpop.f32.mrb[6].mxu0 }
 0x1c3   :  { %v631_v6 = vmul.f32 %v1946_v28, %v613_v4  ;;  %2609 = vmatpush3.bf16.msra.mxu1 %v2687_v33  ;;  %v564_v7 = vmul.f32 %v2317_v5, %v1937_v27  ;;  %v2337_v8 = vpop.f32.mrb[6].mxu1  ;;  %v546_v9 = vpop.f32.mrb[7].mxu0  ;;  %2590 = vmatprep.subr.bf16.mxu0 %v2688_v10 }
 0x1c4   :  { %v637_v11 = vadd.f32 %v633_v2, %v563_v63  ;;  %v634_v12 = vmul.f32 %v2337_v8, %v1946_v28  ;;  %v562_v13 = vmul.f32 %v1937_v27, %v546_v9  ;;  %v616_v15 = vpop.f32.mrb[7].mxu1  ;;  %2610 = vmatprep.subr.bf16.mxu1 %v2688_v10 }
 0x1c5   :  { %v635_v18 = vadd.f32 %v631_v6, %v561_v3  ;;  %v632_v21 = vmul.f32 %v1946_v28, %v616_v15 }
 0x1c6   :  { %v638_v23 = vadd.f32 %v634_v12, %v564_v7  ;;  %2591 = vmatpush3.bf16.msra.mxu0 %v2688_v10 }
 0x1c7   :  { %v636_v25 = vadd.f32 %v632_v21, %v562_v13  ;;  %2611 = vmatpush3.bf16.msra.mxu1 %v2688_v10  ;;  %2592 = vmatprep.subr.bf16.mxu0 %v2689_v26  ;;  %v1991_v10 = vsel %vm998_vm10, 1.0, %v2742_v32 }
 0x1c8   :  { %2612 = vmatprep.subr.bf16.mxu1 %v2689_v26 }
 0x1ca   :  { %2593 = vmatpush3.bf16.msra.mxu0 %v2689_v26 }
 0x1cb   :  { %2613 = vmatpush3.bf16.msra.mxu1 %v2689_v26 }
 0x1cd   :  { %2595 = vmatmul.mubr.msk.bf16.vlgmr.msra.gmra.mrb[32].mxu0 %vm3249_vm8, %v2741_v40  ;;  %vm850_vm8 = vcmp.eq.s32.totalorder %v3500_v20, 4 }
 0x1ce   :  { %2615 = vmatmul.mubr.msk.bf16.vlgmr.msra.gmra.mrb[32].mxu1 %vm3256_vm6, %v2741_v40  ;;  %vm924_vm6 = vcmp.eq.s32.totalorder %v3500_v20, 5  ;;  %v1973_v54 = vsel %vm850_vm8, 1.0, %v2742_v32  ;;  %vm3736_vm8 = vmmov %vm3735_vm7 }
 0x1cf   :  { %v1982_v55 = vsel %vm924_vm6, 1.0, %v2742_v32  ;;  %vm3737_vm6 = vmmov %vm3735_vm7 }
 0x1d0   :  { %vm3738_vm10 = vmmov %vm3737_vm6 }
 0x1e0   :  { %v2356_v31 = vpop.f32.mrb[8].mxu0 }
 0x1e1   :  { %v707_v34 = vmul.f32 %v2356_v31, %v1955_v29  ;;  %v2376_v35 = vpop.f32.mrb[8].mxu1  ;;  %v687_v36 = vpop.f32.mrb[9].mxu0 }
 0x1e2   :  { %v781_v37 = vmul.f32 %v2376_v35, %v1964_v30  ;;  %v705_v38 = vmul.f32 %v1955_v29, %v687_v36  ;;  %v761_v39 = vpop.f32.mrb[9].mxu1  ;;  %v2357_v41 = vpop.f32.mrb[10].mxu0 }
 0x1e3   :  { %v711_v14 = vadd.f32 %v707_v34, %v637_v11  ;;  %v779_v16 = vmul.f32 %v1964_v30, %v761_v39  ;;  %v708_v42 = vmul.f32 %v2357_v41, %v1955_v29  ;;  %v2377_v40 = vpop.f32.mrb[10].mxu1  ;;  %v690_v17 = vpop.f32.mrb[11].mxu0  ;;  %v2000_v11 = vsel %vm1072_vm4, 1.0, %v2742_v32  ;;  %vm3739_vm4 = vmmov %vm3737_vm6 }
 0x1e4   :  { %v709_v43 = vadd.f32 %v705_v38, %v635_v18  ;;  %v782_v44 = vmul.f32 %v2377_v40, %v1964_v30  ;;  %v706_v45 = vmul.f32 %v1955_v29, %v690_v17  ;;  %v764_v46 = vpop.f32.mrb[11].mxu1 }
 0x1e5   :  { %v785_v47 = vadd.f32 %v781_v37, %v711_v14  ;;  %v712_v48 = vadd.f32 %v708_v42, %v638_v23  ;;  %v780_v49 = vmul.f32 %v1964_v30, %v764_v46  ;;  %v1762_v46 = vld [vmem:[%s3639_s9 + $0x10] sm:$0xff] }
 0x1e6   :  { %v783_v50 = vadd.f32 %v779_v16, %v709_v43  ;;  %v710_v51 = vadd.f32 %v706_v45, %v636_v25  ;;  %v1761_v45 = vld [vmem:[%s3639_s9 + $0x8] sm:$0xff] }
 0x1e7   :  { %v786_v52 = vadd.f32 %v782_v44, %v712_v48  ;;  %v1760_v44 = vld [vmem:[%s3639_s9] sm:$0xff]  ;;  %v1763_v48 = vld [vmem:[%s3639_s9 + $0x18] sm:$0xff]  ;;  %s2743_s9 = smov 16  }
 0x1e8   :  { %v784_v53 = vadd.f32 %v780_v49, %v710_v51  ;;  %v2644_v49 = vpack.c.bf16 %v1763_v48, %v1762_v46  ;;  %v2018_v51 = vsel %vm1220_vm15, 1.0, %v2742_v32 }
 0x200   :  { %v2396_v56 = vpop.f32.mrb[12].mxu0 }
 0x201   :  { %v855_v57 = vmul.f32 %v2396_v56, %v1973_v54  ;;  %v2416_v58 = vpop.f32.mrb[12].mxu1  ;;  %v835_v59 = vpop.f32.mrb[13].mxu0 }
 0x202   :  { %v929_v60 = vmul.f32 %v2416_v58, %v1982_v55  ;;  %v853_v61 = vmul.f32 %v1973_v54, %v835_v59  ;;  %v909_v19 = vpop.f32.mrb[13].mxu1  ;;  %v2397_v22 = vpop.f32.mrb[14].mxu0 }
 0x203   :  { %v859_v24 = vadd.f32 %v855_v57, %v785_v47  ;;  %v927_v27 = vmul.f32 %v1982_v55, %v909_v19  ;;  %v856_v28 = vmul.f32 %v2397_v22, %v1973_v54  ;;  %v2417_v33 = vpop.f32.mrb[14].mxu1  ;;  %v838_v62 = vpop.f32.mrb[15].mxu0  ;;  %v2640_v47 = vpack.c.bf16 %v1761_v45, %v1760_v44 }
 0x204   :  { %v857_v63 = vadd.f32 %v853_v61, %v783_v50  ;;  %v930_v0 = vmul.f32 %v2417_v33, %v1982_v55  ;;  %v854_v1 = vmul.f32 %v1973_v54, %v838_v62  ;;  %v912_v2 = vpop.f32.mrb[15].mxu1  ;;  %v2009_v50 = vsel %vm1146_vm13, 1.0, %v2742_v32  ;;  %vm3740_vm13 = vmmov %vm3739_vm4 }
 0x205   :  { %v933_v3 = vadd.f32 %v929_v60, %v859_v24  ;;  %v860_v4 = vadd.f32 %v856_v28, %v786_v52  ;;  %v928_v5 = vmul.f32 %v1982_v55, %v912_v2  ;;  %2641 = vmatprep.subr.bf16.mxu0 %v2640_v47 }
 0x206   :  { %v931_v6 = vadd.f32 %v927_v27, %v857_v63  ;;  %v858_v7 = vadd.f32 %v854_v1, %v784_v53  ;;  %2643 = vmatpush3.bf16.msra.mxu0 %v2640_v47 }
 0x207   :  { %v934_v8 = vadd.f32 %v930_v0, %v860_v4  ;;  %2645 = vmatprep.subr.bf16.mxu0 %v2644_v49 }
 0x208   :  { %v932_v9 = vadd.f32 %v928_v5, %v858_v7  ;;  %v2036_v7 = vsel %vm1368_vm3, 1.0, %v2742_v32 }
 0x20a   :  { %2647 = vmatpush3.bf16.msra.mxu0 %v2644_v49 }
 0x220   :  { %v2436_v12 = vpop.f32.mrb[16].mxu0 }
 0x221   :  { %v1003_v13 = vmul.f32 %v2436_v12, %v1991_v10  ;;  %v2456_v15 = vpop.f32.mrb[16].mxu1  ;;  %v983_v18 = vpop.f32.mrb[17].mxu0 }
 0x222   :  { %v1077_v21 = vmul.f32 %v2456_v15, %v2000_v11  ;;  %v1001_v23 = vmul.f32 %v1991_v10, %v983_v18  ;;  %v1057_v25 = vpop.f32.mrb[17].mxu1  ;;  %v2437_v26 = vpop.f32.mrb[18].mxu0 }
 0x223   :  { %v1007_v29 = vadd.f32 %v1003_v13, %v933_v3  ;;  %v1075_v30 = vmul.f32 %v2000_v11, %v1057_v25  ;;  %v1004_v31 = vmul.f32 %v2437_v26, %v1991_v10  ;;  %v2457_v34 = vpop.f32.mrb[18].mxu1  ;;  %v986_v35 = vpop.f32.mrb[19].mxu0 }
 0x224   :  { %v1005_v36 = vadd.f32 %v1001_v23, %v931_v6  ;;  %v1078_v37 = vmul.f32 %v2457_v34, %v2000_v11  ;;  %v1002_v38 = vmul.f32 %v1991_v10, %v986_v35  ;;  %v1060_v39 = vpop.f32.mrb[19].mxu1  ;;  %v2027_v6 = vsel %vm1294_vm2, 1.0, %v2742_v32 }
 0x225   :  { %v1081_v41 = vadd.f32 %v1077_v21, %v1007_v29  ;;  %v1008_v14 = vadd.f32 %v1004_v31, %v934_v8  ;;  %v1076_v16 = vmul.f32 %v2000_v11, %v1060_v39 }
 0x226   :  { %v1079_v42 = vadd.f32 %v1075_v30, %v1005_v36  ;;  %v1006_v40 = vadd.f32 %v1002_v38, %v932_v9 }
 0x227   :  { %v1082_v17 = vadd.f32 %v1078_v37, %v1008_v14 }
 0x228   :  { %v1080_v43 = vadd.f32 %v1076_v16, %v1006_v40  ;;  %v2054_v40 = vsel %vm1516_vm1, 1.0, %v2742_v32 }
 0x240   :  { %v2476_v52 = vpop.f32.mrb[20].mxu0 }
 0x241   :  { %v1151_v53 = vmul.f32 %v2476_v52, %v2009_v50  ;;  %v2496_v54 = vpop.f32.mrb[20].mxu1  ;;  %v1131_v55 = vpop.f32.mrb[21].mxu0 }
 0x242   :  { %v1225_v56 = vmul.f32 %v2496_v54, %v2018_v51  ;;  %v1149_v57 = vmul.f32 %v2009_v50, %v1131_v55  ;;  %v1205_v58 = vpop.f32.mrb[21].mxu1  ;;  %v2477_v59 = vpop.f32.mrb[22].mxu0 }
 0x243   :  { %v1155_v60 = vadd.f32 %v1151_v53, %v1081_v41  ;;  %v1223_v61 = vmul.f32 %v2018_v51, %v1205_v58  ;;  %v1152_v19 = vmul.f32 %v2477_v59, %v2009_v50  ;;  %v2497_v22 = vpop.f32.mrb[22].mxu1  ;;  %v1134_v24 = vpop.f32.mrb[23].mxu0 }
 0x244   :  { %v1153_v27 = vadd.f32 %v1149_v57, %v1079_v42  ;;  %v1226_v28 = vmul.f32 %v2497_v22, %v2018_v51  ;;  %v1150_v33 = vmul.f32 %v2009_v50, %v1134_v24  ;;  %v1208_v62 = vpop.f32.mrb[23].mxu1  ;;  %v2045_v42 = vsel %vm1442_vm5, 1.0, %v2742_v32 }
 0x245   :  { %v1229_v63 = vadd.f32 %v1225_v56, %v1155_v60  ;;  %v1156_v0 = vadd.f32 %v1152_v19, %v1082_v17  ;;  %v1224_v1 = vmul.f32 %v2018_v51, %v1208_v62 }
 0x246   :  { %v1227_v2 = vadd.f32 %v1223_v61, %v1153_v27  ;;  %v1154_v3 = vadd.f32 %v1150_v33, %v1080_v43  ;;  %v2072_v33 = vsel %vm1664_vm0, 1.0, %v2742_v32 }
 0x247   :  { %v1230_v4 = vadd.f32 %v1226_v28, %v1156_v0  ;;  %v2063_v28 = vsel %vm1590_vm12, 1.0, %v2742_v32  ;;  %v1675_v32 = vld [vmem:[#allocation2] sm:$0xff] }
 0x248   :  { %v1228_v5 = vadd.f32 %v1224_v1, %v1154_v3 }
 0x260   :  { %v2516_v8 = vpop.f32.mrb[24].mxu0 }
 0x261   :  { %v1299_v9 = vmul.f32 %v2516_v8, %v2027_v6  ;;  %v2536_v10 = vpop.f32.mrb[24].mxu1  ;;  %v1279_v11 = vpop.f32.mrb[25].mxu0 }
 0x262   :  { %v1373_v12 = vmul.f32 %v2536_v10, %v2036_v7  ;;  %v1297_v13 = vmul.f32 %v2027_v6, %v1279_v11  ;;  %v1353_v15 = vpop.f32.mrb[25].mxu1  ;;  %v2517_v18 = vpop.f32.mrb[26].mxu0  ;;  %v1677_v11 = vld [vmem:[#allocation2 + $0x10] sm:$0xff] }
 0x263   :  { %v1303_v21 = vadd.f32 %v1299_v9, %v1229_v63  ;;  %v1371_v23 = vmul.f32 %v2036_v7, %v1353_v15  ;;  %v1300_v25 = vmul.f32 %v2517_v18, %v2027_v6  ;;  %v2537_v26 = vpop.f32.mrb[26].mxu1  ;;  %v1282_v29 = vpop.f32.mrb[27].mxu0 }
 0x264   :  { %v1301_v30 = vadd.f32 %v1297_v13, %v1227_v2  ;;  %v1374_v31 = vmul.f32 %v2537_v26, %v2036_v7  ;;  %v1298_v34 = vmul.f32 %v2027_v6, %v1282_v29  ;;  %v1356_v35 = vpop.f32.mrb[27].mxu1  ;;  %v1678_v26 = vld [vmem:[#allocation2 + $0x18] sm:$0xff] }
 0x265   :  { %v1377_v36 = vadd.f32 %v1373_v12, %v1303_v21  ;;  %v1304_v37 = vadd.f32 %v1300_v25, %v1230_v4  ;;  %v1372_v38 = vmul.f32 %v2036_v7, %v1356_v35 }
 0x266   :  { %v1375_v39 = vadd.f32 %v1371_v23, %v1301_v30  ;;  %v1302_v41 = vadd.f32 %v1298_v34, %v1228_v5  ;;  %v1676_v34 = vld [vmem:[#allocation2 + $0x8] sm:$0xff] }
 0x267   :  { %v1378_v14 = vadd.f32 %v1374_v31, %v1304_v37 }
 0x268   :  { %v1376_v16 = vadd.f32 %v1372_v38, %v1302_v41 }
 0x280   :  { %v2556_v17 = vpop.f32.mrb[28].mxu0 }
 0x281   :  { %v1447_v43 = vmul.f32 %v2556_v17, %v2045_v42  ;;  %v2576_v44 = vpop.f32.mrb[28].mxu1  ;;  %v1427_v45 = vpop.f32.mrb[29].mxu0 }
 0x282   :  { %v1521_v46 = vmul.f32 %v2576_v44, %v2054_v40  ;;  %v1445_v47 = vmul.f32 %v2045_v42, %v1427_v45  ;;  %v1501_v48 = vpop.f32.mrb[29].mxu1  ;;  %v2557_v49 = vpop.f32.mrb[30].mxu0 }
 0x283   :  { %v1451_v50 = vadd.f32 %v1447_v43, %v1377_v36  ;;  %v1519_v51 = vmul.f32 %v2054_v40, %v1501_v48  ;;  %v1448_v52 = vmul.f32 %v2557_v49, %v2045_v42  ;;  %v2577_v53 = vpop.f32.mrb[30].mxu1  ;;  %v1430_v54 = vpop.f32.mrb[31].mxu0 }
 0x284   :  { %v1449_v55 = vadd.f32 %v1445_v47, %v1375_v39  ;;  %v1522_v56 = vmul.f32 %v2577_v53, %v2054_v40  ;;  %v1446_v57 = vmul.f32 %v2045_v42, %v1430_v54  ;;  %v1504_v58 = vpop.f32.mrb[31].mxu1  ;;  %v1711_v42 = vpop.permute.xlu1 %1710 }
 0x285   :  { %v1525_v59 = vadd.f32 %v1521_v46, %v1451_v50  ;;  %v1452_v60 = vadd.f32 %v1448_v52, %v1378_v14  ;;  %v1520_v61 = vmul.f32 %v2054_v40, %v1504_v58  ;;  %v1716_v40 = vpop.permute.xlu0 %1715  ;;  %2674 = vrcp.f32 %v1711_v42 }
 0x286   :  { %v1523_v19 = vadd.f32 %v1519_v51, %v1449_v55  ;;  %v1450_v22 = vadd.f32 %v1446_v57, %v1376_v16  ;;  %2676 = vrcp.f32 %v1716_v40 }
 0x287   :  { %v1526_v24 = vadd.f32 %v1522_v56, %v1452_v60 }
 0x288   :  { %v1524_v27 = vadd.f32 %v1520_v61, %v1450_v22  ;;  %v1721_v17 = vpop.permute.xlu1 %1720 }
 0x289   :  { %v1726_v43 = vpop.permute.xlu0 %1725  ;;  %2678 = vrcp.f32 %v1721_v17 }
 0x28a   :  { %2680 = vrcp.f32 %v1726_v43 }
 0x28f   :  { %v2675_v44 = vpop.eup %2674 }
 0x290   :  { %v2677_v46 = vpop.eup %2676 }
 0x293   :  { %v2679_v50 = vpop.eup %2678 }
 0x294   :  { %v2681_v54 = vpop.eup %2680 }
 0x2a0   :  { %v2596_v62 = vpop.f32.mrb[32].mxu0 }
 0x2a1   :  { %v1595_v63 = vmul.f32 %v2596_v62, %v2063_v28  ;;  %v2616_v0 = vpop.f32.mrb[32].mxu1  ;;  %v1575_v1 = vpop.f32.mrb[33].mxu0 }
 0x2a2   :  { %v1669_v2 = vmul.f32 %v2616_v0, %v2072_v33  ;;  %v1593_v3 = vmul.f32 %v2063_v28, %v1575_v1  ;;  %v1649_v4 = vpop.f32.mrb[33].mxu1  ;;  %v2597_v5 = vpop.f32.mrb[34].mxu0 }
 0x2a3   :  { %v1599_v6 = vadd.f32 %v1595_v63, %v1525_v59  ;;  %v1667_v7 = vmul.f32 %v2072_v33, %v1649_v4  ;;  %v1596_v8 = vmul.f32 %v2597_v5, %v2063_v28  ;;  %v2617_v9 = vpop.f32.mrb[34].mxu1  ;;  %v1578_v10 = vpop.f32.mrb[35].mxu0 }
 0x2a4   :  { %v1597_v12 = vadd.f32 %v1593_v3, %v1523_v19  ;;  %v1670_v20 = vmul.f32 %v2617_v9, %v2072_v33  ;;  %v1594_v13 = vmul.f32 %v2063_v28, %v1578_v10  ;;  %v1652_v15 = vpop.f32.mrb[35].mxu1 }
 0x2a5   :  { %v1673_v18 = vadd.f32 %v1669_v2, %v1599_v6  ;;  %v1600_v21 = vadd.f32 %v1596_v8, %v1526_v24  ;;  %v1668_v23 = vmul.f32 %v2072_v33, %v1652_v15 }
 0x2a6   :  { %v1671_v25 = vadd.f32 %v1667_v7, %v1597_v12  ;;  %v1598_v29 = vadd.f32 %v1594_v13, %v1524_v27 }
 0x2a7   :  { %v1681_v30 = vadd.f32 %v1677_v11, %v1673_v18  ;;  %v1674_v31 = vadd.f32 %v1670_v20, %v1600_v21 }
 0x2a8   :  { %v1679_v35 = vadd.f32 %v1675_v32, %v1671_v25  ;;  %v1672_v36 = vadd.f32 %v1668_v23, %v1598_v29 }
 0x2a9   :  { %1686 = vst.msk [vmem:[#allocation2 + $0x10] sm:$0xff] %vm50_vm14, %v1681_v30  ;;  %v1682_v37 = vadd.f32 %v1678_v26, %v1674_v31 }
 0x2aa   :  { %1684 = vst.msk [vmem:[#allocation2] sm:$0xff] %vm50_vm14, %v1679_v35  ;;  %v1680_v38 = vadd.f32 %v1676_v34, %v1672_v36 }
 0x2ab   :  { %1687 = vst.msk [vmem:[#allocation2 + $0x18] sm:$0xff] %vm50_vm14, %v1682_v37 }
 0x2ac   :  { %1685 = vst.msk [vmem:[#allocation2 + $0x8] sm:$0xff] %vm50_vm14, %v1680_v38 }
 0x2b0   :  { %v1706_v14 = vld [vmem:[#allocation2 + $0x10] sm:$0xff] }
 0x2b1   :  { %v1704_v39 = vld [vmem:[#allocation2] sm:$0xff]  ;;  %v1733_v52 = vmul.f32 %v2679_v50, %v1706_v14 }
 0x2b2   :  { %1740 = vrot.lane.b32.xlu1 %v1704_v39, %s2743_s9  ;;  %v1707_v16 = vld [vmem:[#allocation2 + $0x18] sm:$0xff]  ;;  %v1729_v45 = vmul.f32 %v2675_v44, %v1704_v39 }
 0x2b3   :  { %v1705_v41 = vld [vmem:[#allocation2 + $0x8] sm:$0xff]  ;;  %v1735_v56 = vmul.f32 %v2681_v54, %v1707_v16 }
 0x2b4   :  { %1742 = vrot.lane.b32.xlu0 %v1705_v41, %s2743_s9  ;;  %v1731_v48 = vmul.f32 %v2677_v46, %v1705_v41 }
 0x2b6   :  { %1744 = vrot.lane.b32.xlu1 %v1706_v14, %s2743_s9 }
 0x2b8   :  { %1746 = vrot.lane.b32.xlu0 %v1707_v16, %s2743_s9 }
 0x324   :  { %v1741_v47 = vpop.permute.xlu1 %1740 }
 0x325   :  { %v1752_v49 = vsel %vm50_vm14, %v1729_v45, %v1741_v47 }
 0x326   :  { %1756 = vst.msk [vmem:[#allocation4] sm:$0xff] %vm3733_vm9, %v1752_v49  ;;  %v1743_v51 = vpop.permute.xlu0 %1742  ;;  %2626 = vmatprep.mubr.msk.f32.mxu0 %vm3734_vm11, %v1752_v49 }
 0x327   :  { %v1753_v53 = vsel %vm50_vm14, %v1731_v48, %v1743_v51 }
 0x328   :  { %1757 = vst.msk [vmem:[#allocation4 + $0x8] sm:$0xff] %vm3735_vm7, %v1753_v53  ;;  %v1745_v55 = vpop.permute.xlu1 %1744  ;;  %2627 = vmatmul.mubr.msk.f32.vlgmr.msra.gmra.mrb[36].mxu0 %vm3736_vm8, %v1753_v53 }
 0x329   :  { %v1754_v57 = vsel %vm50_vm14, %v1733_v52, %v1745_v55 }
 0x32a   :  { %1758 = vst.msk [vmem:[#allocation4 + $0x10] sm:$0xff] %vm3737_vm6, %v1754_v57  ;;  %v1747_v58 = vpop.permute.xlu0 %1746  ;;  %2629 = vmatprep.mubr.msk.f32.mxu0 %vm3738_vm10, %v1754_v57 }
 0x32b   :  { %v1755_v59 = vsel %vm50_vm14, %v1735_v56, %v1747_v58 }
 0x32c   :  { %1759 = vst.msk [vmem:[#allocation4 + $0x18] sm:$0xff] %vm3739_vm4, %v1755_v59  ;;  %2630 = vmatmul.mubr.msk.f32.gmra.mrb[38].mxu0 %vm3740_vm13, %v1755_v59 }
 0x32d   :  { %2701 = shalt.err (!%p2698_p4)
}
 0x32e   :  { %s2702_s27 = scalar_lea.hbm %s3642_s12, 512 }
 0x32f   :  { %p2703_p5 = scmp.ne.s32.totalorder %s3642_s12, %s2702_s27  ;;  %p2706_p6 = scmp.lt.u32.totalorder %s2702_s27, %s3642_s12 }
 0x331   :  { %p2708_p7 = pnand %p2706_p6, %p2703_p5 }
 0x333   :  { %2711 = shalt.err (!%p2708_p7)
}
 0x334   :  { %s2745_s15 = smov 128   ;;  %s2746_s4 = smov 8  }
 0x335   :  { %1886 = dma.vmem_to_hbm [thread:$0]  %s1881_s24, 512, %s3642_s12, [#allocation5], %s2745_s15, %s2745_s15, %s2746_s4  }
 0x336   :  { %s2747_s18 = smov [#allocation6]  }
 0x337   :  { %s1893_s0 = sshll.u32 %s2747_s18, 4  ;;  %s1894_s0 = int_to_ptr.vmem [resolvable:$true] %s1893_s0 }
 0x338   :  { %s2712_s19 = scalar_lea.vmem %s1894_s0, 128  ;;  %p2717_p9 = scmp.lt.s32.totalorder %s1894_s0, %s1894_s0 }
 0x339   :  { %p2713_p8 = scmp.ne.s32.totalorder %s1894_s0, %s2712_s19  ;;  %p2718_p10 = scmp.lt.s32.totalorder %s2712_s19, %s2712_s19 }
 0x33b   :  { %p2719_p11 = por %p2718_p10, %p2717_p9 }
 0x33d   :  { %p2720_p12 = pnand %p2719_p11, %p2713_p8 }
 0x33f   :  { %2723 = shalt.err (!%p2720_p12)
}
 0x340   :  { %s2724_s21 = scalar_lea.hbm %s3643_s13, 128 }
 0x341   :  { %p2725_p13 = scmp.ne.s32.totalorder %s3643_s13, %s2724_s21  ;;  %p2728_p0 = scmp.lt.u32.totalorder %s2724_s21, %s3643_s13 }
 0x343   :  { %p2730_p1 = pnand %p2728_p0, %p2725_p13 }
 0x345   :  { %2733 = shalt.err (!%p2730_p1)
}
 0x346   :  { %1896 = dma.vmem_to_hbm [thread:$0]  %s1894_s0, 128, %s3643_s13, [#allocation7]   ;;  %v2073_v60 = vld [vmem:[%s3640_s10] ss:$0 sm:$0xff]  ;;  %vm1868_vm14 = vcmask 15360  }
 0x3fb   :  { %v2628_v61 = vpop.f32.mrb[36].mxu0 }
 0x3fc   :  { %v1855_v19 = vadd.f32 %v2628_v61, %v2073_v60  ;;  %v1849_v22 = vpop.f32.mrb[37].mxu0 }
 0x3fd   :  { %v1850_v24 = vadd.f32 %v2073_v60, %v1849_v22 }
 0x3fe   :  { %1870 = vst.msk [vmem:[%s3641_s11 + $0x8] sm:$0xff] %vm1868_vm14, %v1855_v19 }
 0x3ff   :  { %1869 = vst.msk [vmem:[%s3641_s11] sm:$0xff] %vm1868_vm14, %v1850_v24  ;;  %v2631_v27 = vpop.f32.mrb[38].mxu0 }
 0x400   :  { %v1865_v28 = vadd.f32 %v2631_v27, %v2073_v60  ;;  %v1859_v33 = vpop.f32.mrb[39].mxu0 }
 0x401   :  { %v1860_v62 = vadd.f32 %v2073_v60, %v1859_v33 }
 0x402   :  { %1872 = vst.msk [vmem:[%s3641_s11 + $0x18] sm:$0xff] %vm1868_vm14, %v1865_v28 }
 0x403   :  { %1871 = vst.msk [vmem:[%s3641_s11 + $0x10] sm:$0xff] %vm1868_vm14, %v1860_v62 }
 0x404   :  { %2734 = dma.done.wait [#allocation5], 512  }
 0x405   :  { %2735 = vsyncadd [#allocation5], 4294966784 }
 0x406   :  { %2736 = dma.done.wait [#allocation7], 128  }
 0x407   :  { %2737 = vsyncadd [#allocation7], 4294967168 }
 0x408   :  { %1905 = vsyncpa [#allocation5], 1 }
 0x409   :  { %1906 = vsyncpa [#allocation7], 1 }

</bundles_post_ra>
